<compile_context>
chip_gen: v7x
topology: tpu7x:2x2x1
jax: 0.10.0
libtpu: 0.0.40
codegen_flags: <defaults>
</compile_context>

<pallas_src>
import functools

import jax
import jax.numpy as jnp
from jax.experimental import pallas as pl
from jax.experimental.pallas import tpu as pltpu


# ----------------------------------------------------------------------------
# Pallas kernel: direct 3x3 "same" conv (+bias, optional ReLU).
# One output row per grid step; the 3x3 taps are accumulated in VMEM with
# 9 small MXU matmuls -- no im2col tensor is ever materialized in HBM.
# ----------------------------------------------------------------------------
def _conv3x3_row_kernel(x0_ref, x1_ref, x2_ref, w_ref, b_ref, o_ref, *,
                        relu: bool, w_out: int):
    # x{dy}_ref : (1, 1, Wp, Cin)   padded input rows h, h+1, h+2
    # w_ref     : (3, 3, Cin, Cout) HWIO weights (VMEM-resident across grid)
    # b_ref     : (1, Cout) float32
    # o_ref     : (1, 1, w_out, Cout)
    cout = o_ref.shape[-1]
    acc = jnp.zeros((w_out, cout), jnp.float32)
    rows = (x0_ref[0, 0], x1_ref[0, 0], x2_ref[0, 0])     # each (Wp, Cin)
    for dy in range(3):
        row = rows[dy]
        for dx in range(3):
            acc = acc + jnp.dot(row[dx:dx + w_out, :], w_ref[dy, dx],
                                preferred_element_type=jnp.float32)
    acc = acc + b_ref[...]                                # f32 epilogue
    if relu:
        acc = jnp.maximum(acc, 0.0)
    o_ref[0, 0] = acc.astype(o_ref.dtype)


def conv3x3_same(xp_nhwc, w_hwio, b, *, relu, out_dtype):
    """3x3 stride-1 'same' conv over an already spatially-padded NHWC tensor.

    xp_nhwc : (N, H+2, W+2, Cin)  padded input (f32 or bf16)
    w_hwio  : (3, 3, Cin, Cout)   same dtype as xp_nhwc
    b       : (Cout,)             float32
    """
    N, Hp, Wp, Cin = xp_nhwc.shape
    H, W = Hp - 2, Wp - 2
    Cout = w_hwio.shape[-1]
    kernel = functools.partial(_conv3x3_row_kernel, relu=relu, w_out=W)
    return pl.pallas_call(
        kernel,
        out_shape=jax.ShapeDtypeStruct((N, H, W, Cout), out_dtype),
        grid=(N, H),
        in_specs=[
            # Three row-offset views of the SAME padded array supply the
            # dy = 0 / 1 / 2 halo rows (3x input reads instead of 9x im2col).
            pl.BlockSpec((1, 1, Wp, Cin), lambda n, h: (n, h, 0, 0)),
            pl.BlockSpec((1, 1, Wp, Cin), lambda n, h: (n, h + 1, 0, 0)),
            pl.BlockSpec((1, 1, Wp, Cin), lambda n, h: (n, h + 2, 0, 0)),
            # Weights / bias: constant index map -> stay resident in VMEM.
            pl.BlockSpec((3, 3, Cin, Cout), lambda n, h: (0, 0, 0, 0)),
            pl.BlockSpec((1, Cout), lambda n, h: (0, 0)),
        ],
        out_specs=pl.BlockSpec((1, 1, W, Cout), lambda n, h: (n, h, 0, 0)),
        compiler_params=pltpu.CompilerParams(
            dimension_semantics=("parallel", "parallel"),
            vmem_limit_bytes=32 * 1024 * 1024,
        ),
    )(xp_nhwc, xp_nhwc, xp_nhwc, w_hwio,
      b.reshape(1, Cout).astype(jnp.float32))


# ----------------------------------------------------------------------------
# Plain-JAX helpers (layout plumbing only)
# ----------------------------------------------------------------------------
def _to_hwio(w_oihw):
    # PyTorch nn.Conv2d (Cout, Cin, kh, kw) -> (kh, kw, Cin, Cout)
    return jnp.transpose(w_oihw, (2, 3, 1, 0))


def _pad_hw(x_nhwc):
    return jnp.pad(x_nhwc, ((0, 0), (1, 1), (1, 1), (0, 0)))


# ----------------------------------------------------------------------------
# Parameter construction (deterministic, synthetic)
# ----------------------------------------------------------------------------
def make_params(key, in_ch=3, feat_ch=32, num_classes=4):
    ks = jax.random.split(key, 12)

    def conv_p(k, cout, cin):
        kw, kb = jax.random.split(k)
        w = 0.05 * jax.random.normal(kw, (cout, cin, 3, 3), jnp.float32)
        b = 0.01 * jax.random.normal(kb, (cout,), jnp.float32)
        return w, b

    params = {
        # pixel_mean / pixel_std buffers (cfg.MODEL.PIXEL_MEAN / PIXEL_STD)
        "pixel_mean": jnp.array([103.53, 116.28, 123.675], jnp.float32),
        "pixel_std": jnp.array([57.375, 57.12, 58.395], jnp.float32),
        # backbone (simplified single-level stem)
        "stem": conv_p(ks[0], feat_ch, in_ch),
        # proposal_generator (FCOS head, one tower layer each)
        "cls_tower": conv_p(ks[1], feat_ch, feat_ch),
        "bbox_tower": conv_p(ks[2], feat_ch, feat_ch),
        "cls_logits": conv_p(ks[3], num_classes, feat_ch),
        "bbox_pred": conv_p(ks[4], 4, feat_ch),
        "ctrness": conv_p(ks[5], 1, feat_ch),
    }
    return params


# ----------------------------------------------------------------------------
# Forward (base-detector path of MetaProposalNetwork)
# ----------------------------------------------------------------------------
def meta_proposal_network_forward(params, images_nchw):
    """images_nchw: (N, 3, H, W) float32, NCHW as in PyTorch."""
    N, C, H, W = images_nchw.shape
    x = jnp.transpose(images_nchw, (0, 2, 3, 1))   # single NCHW->NHWC change

    mean = params["pixel_mean"]
    std = params["pixel_std"]

    # 1) + 2) pixel normalization folded into the stem conv (free):
    #    w' = w / std[cin]
    #    b' = b - sum_{ky,kx,cin} w[ky,kx,cin,:] * mean[cin] / std[cin]
    #    Padding the RAW image with pixel_mean == zero-padding the normalized
    #    image, so the border semantics match normalize-then-conv exactly.
    w_stem, b_stem = params["stem"]
    w_fold = _to_hwio(w_stem) / std.reshape(1, 1, C, 1)
    b_fold = b_stem - jnp.sum(w_fold * mean.reshape(1, 1, C, 1), axis=(0, 1, 2))
    xp = jnp.broadcast_to(mean.reshape(1, 1, 1, C), (N, H + 2, W + 2, C))
    xp = xp.at[:, 1:1 + H, 1:1 + W, :].set(x)
    feat = conv3x3_same(xp, w_fold, b_fold, relu=True,
                        out_dtype=jnp.bfloat16)          # (N,H,W,32)

    # 3) fused FCOS towers: cls_tower (32->32) ++ bbox_tower (32->32) run as a
    #    single 32->64 conv; bf16 operands, f32 accumulation.
    wct, bct = params["cls_tower"]
    wbt, bbt = params["bbox_tower"]
    w_tower = jnp.concatenate([_to_hwio(wct), _to_hwio(wbt)],
                              axis=-1).astype(jnp.bfloat16)
    b_tower = jnp.concatenate([bct, bbt])
    tower = conv3x3_same(_pad_hw(feat), w_tower, b_tower, relu=True,
                         out_dtype=jnp.bfloat16)          # (N,H,W,64)=[cls_t|box_t]

    # 4) fused heads: cls_logits(cls_t)->4, bbox_pred(box_t)->4, ctrness(box_t)->1
    #    as ONE 64->9 conv with block-zero weights (single pass over the tower).
    wl, bl = params["cls_logits"]
    wbp, bbp = params["bbox_pred"]
    wcn, bcn = params["ctrness"]
    fc = wct.shape[0]                    # 32 tower channels per branch
    n_cls = wl.shape[0]                  # num_classes
    w_head = jnp.zeros((3, 3, 2 * fc, n_cls + 5), jnp.float32)
    w_head = w_head.at[:, :, :fc, 0:n_cls].set(_to_hwio(wl))
    w_head = w_head.at[:, :, fc:, n_cls:n_cls + 4].set(_to_hwio(wbp))
    w_head = w_head.at[:, :, fc:, n_cls + 4:n_cls + 5].set(_to_hwio(wcn))
    b_head = jnp.concatenate([bl, bbp, bcn])
    heads = conv3x3_same(_pad_hw(tower), w_head.astype(jnp.bfloat16), b_head,
                         relu=False, out_dtype=jnp.float32)   # (N,H,W,9)

    # return NCHW only for the final (small) outputs, matching the PyTorch API
    to_nchw = lambda t: jnp.transpose(t, (0, 3, 1, 2))
    return {
        "features": to_nchw(feat.astype(jnp.float32)),
        "cls_logits": to_nchw(heads[..., 0:n_cls]),
        "bbox_pred": to_nchw(heads[..., n_cls:n_cls + 4]),
        "ctrness": to_nchw(heads[..., n_cls + 4:n_cls + 5]),
    }


# ----------------------------------------------------------------------------
if __name__ == "__main__":
    key = jax.random.PRNGKey(0)
    k_img, k_par = jax.random.split(key)

    N, C, H, W = 2, 3, 16, 16
    images = 255.0 * jax.random.uniform(k_img, (N, C, H, W), jnp.float32)
    params = make_params(k_par, in_ch=C, feat_ch=32, num_classes=4)

    fwd = jax.jit(meta_proposal_network_forward)
    out = fwd(params, images)
    jax.block_until_ready(out)

    assert out["features"].shape == (N, 32, H, W)
    assert out["cls_logits"].shape == (N, 4, H, W)
    assert out["bbox_pred"].shape == (N, 4, H, W)
    assert out["ctrness"].shape == (N, 1, H, W)

    print("KERNEL_OK")
</pallas_src>

<mosaic_0001>
module attributes {stable_mosaic.version = 11 : i64} {
  func.func @_conv3x3_row_kernel(%arg0: i32, %arg1: i32, %arg2: memref<1x1x18x3xf32, #tpu.memory_space<vmem>>, %arg3: memref<1x1x18x3xf32, #tpu.memory_space<vmem>>, %arg4: memref<1x1x18x3xf32, #tpu.memory_space<vmem>>, %arg5: memref<3x3x3x32xf32, #tpu.memory_space<vmem>>, %arg6: memref<1x32xf32, #tpu.memory_space<vmem>>, %arg7: memref<1x1x16x32xbf16, #tpu.memory_space<vmem>>) attributes {dimension_semantics = [#tpu.dimension_semantics<parallel>, #tpu.dimension_semantics<parallel>], iteration_bounds = array<i64: 2, 16>, scalar_prefetch = 0 : i64, scratch_operands = 0 : i64, tpu.core_type = #tpu.core_type<tc>, window_params = [{transform_indices = @transform_0, window_bounds = array<i64: 1, 1, 18, 3>}, {transform_indices = @transform_1, window_bounds = array<i64: 1, 1, 18, 3>}, {transform_indices = @transform_2, window_bounds = array<i64: 1, 1, 18, 3>}, {pipeline_mode = #tpu.pipeline_mode<synchronous>, transform_indices = @transform_3, window_bounds = array<i64: 3, 3, 3, 32>}, {pipeline_mode = #tpu.pipeline_mode<synchronous>, transform_indices = @transform_4, window_bounds = array<i64: 1, 32>}, {transform_indices = @transform_5, window_bounds = array<i64: 1, 1, 16, 32>}]} {
    %cst = arith.constant 0.000000e+00 : f32
    %0 = vector.broadcast %cst : f32 to vector<16x32xf32>
    %c0 = arith.constant 0 : index
    %c0_0 = arith.constant 0 : index
    %c0_1 = arith.constant 0 : index
    %c0_2 = arith.constant 0 : index
    %1 = vector.load %arg2[%c0, %c0_0, %c0_1, %c0_2] : memref<1x1x18x3xf32, #tpu.memory_space<vmem>>, vector<1x1x18x3xf32>
    %2 = vector.shape_cast %1 : vector<1x1x18x3xf32> to vector<18x3xf32>
    %c0_3 = arith.constant 0 : index
    %c0_4 = arith.constant 0 : index
    %c0_5 = arith.constant 0 : index
    %c0_6 = arith.constant 0 : index
    %3 = vector.load %arg3[%c0_3, %c0_4, %c0_5, %c0_6] : memref<1x1x18x3xf32, #tpu.memory_space<vmem>>, vector<1x1x18x3xf32>
    %4 = vector.shape_cast %3 : vector<1x1x18x3xf32> to vector<18x3xf32>
    %c0_7 = arith.constant 0 : index
    %c0_8 = arith.constant 0 : index
    %c0_9 = arith.constant 0 : index
    %c0_10 = arith.constant 0 : index
    %5 = vector.load %arg4[%c0_7, %c0_8, %c0_9, %c0_10] : memref<1x1x18x3xf32, #tpu.memory_space<vmem>>, vector<1x1x18x3xf32>
    %6 = vector.shape_cast %5 : vector<1x1x18x3xf32> to vector<18x3xf32>
    %7 = vector.extract_strided_slice %2 {offsets = [0, 0], sizes = [16, 3], strides = [1, 1]} : vector<18x3xf32> to vector<16x3xf32>
    %c0_11 = arith.constant 0 : index
    %c0_12 = arith.constant 0 : index
    %c0_13 = arith.constant 0 : index
    %c0_14 = arith.constant 0 : index
    %8 = vector.load %arg5[%c0_11, %c0_12, %c0_13, %c0_14] : memref<3x3x3x32xf32, #tpu.memory_space<vmem>>, vector<1x1x3x32xf32>
    %9 = vector.shape_cast %8 : vector<1x1x3x32xf32> to vector<3x32xf32>
    %cst_15 = arith.constant dense<0.000000e+00> : vector<16x32xf32>
    %10 = tpu.matmul %7, %9, %cst_15 {dimension_numbers = #tpu.dot_dimension_numbers<[1], [0], [0], [1], [0, 0, 1, 1], [], []>} : vector<16x3xf32>, vector<3x32xf32>, vector<16x32xf32> -> vector<16x32xf32>
    %11 = arith.addf %0, %10 : vector<16x32xf32>
    %12 = vector.extract_strided_slice %2 {offsets = [1, 0], sizes = [16, 3], strides = [1, 1]} : vector<18x3xf32> to vector<16x3xf32>
    %c0_16 = arith.constant 0 : index
    %c1 = arith.constant 1 : index
    %c0_17 = arith.constant 0 : index
    %c0_18 = arith.constant 0 : index
    %13 = vector.load %arg5[%c0_16, %c1, %c0_17, %c0_18] : memref<3x3x3x32xf32, #tpu.memory_space<vmem>>, vector<1x1x3x32xf32>
    %14 = vector.shape_cast %13 : vector<1x1x3x32xf32> to vector<3x32xf32>
    %cst_19 = arith.constant dense<0.000000e+00> : vector<16x32xf32>
    %15 = tpu.matmul %12, %14, %cst_19 {dimension_numbers = #tpu.dot_dimension_numbers<[1], [0], [0], [1], [0, 0, 1, 1], [], []>} : vector<16x3xf32>, vector<3x32xf32>, vector<16x32xf32> -> vector<16x32xf32>
    %16 = arith.addf %11, %15 : vector<16x32xf32>
    %17 = vector.extract_strided_slice %2 {offsets = [2, 0], sizes = [16, 3], strides = [1, 1]} : vector<18x3xf32> to vector<16x3xf32>
    %c0_20 = arith.constant 0 : index
    %c2 = arith.constant 2 : index
    %c0_21 = arith.constant 0 : index
    %c0_22 = arith.constant 0 : index
    %18 = vector.load %arg5[%c0_20, %c2, %c0_21, %c0_22] : memref<3x3x3x32xf32, #tpu.memory_space<vmem>>, vector<1x1x3x32xf32>
    %19 = vector.shape_cast %18 : vector<1x1x3x32xf32> to vector<3x32xf32>
    %cst_23 = arith.constant dense<0.000000e+00> : vector<16x32xf32>
    %20 = tpu.matmul %17, %19, %cst_23 {dimension_numbers = #tpu.dot_dimension_numbers<[1], [0], [0], [1], [0, 0, 1, 1], [], []>} : vector<16x3xf32>, vector<3x32xf32>, vector<16x32xf32> -> vector<16x32xf32>
    %21 = arith.addf %16, %20 : vector<16x32xf32>
    %22 = vector.extract_strided_slice %4 {offsets = [0, 0], sizes = [16, 3], strides = [1, 1]} : vector<18x3xf32> to vector<16x3xf32>
    %c1_24 = arith.constant 1 : index
    %c0_25 = arith.constant 0 : index
    %c0_26 = arith.constant 0 : index
    %c0_27 = arith.constant 0 : index
    %23 = vector.load %arg5[%c1_24, %c0_25, %c0_26, %c0_27] : memref<3x3x3x32xf32, #tpu.memory_space<vmem>>, vector<1x1x3x32xf32>
    %24 = vector.shape_cast %23 : vector<1x1x3x32xf32> to vector<3x32xf32>
    %cst_28 = arith.constant dense<0.000000e+00> : vector<16x32xf32>
    %25 = tpu.matmul %22, %24, %cst_28 {dimension_numbers = #tpu.dot_dimension_numbers<[1], [0], [0], [1], [0, 0, 1, 1], [], []>} : vector<16x3xf32>, vector<3x32xf32>, vector<16x32xf32> -> vector<16x32xf32>
    %26 = arith.addf %21, %25 : vector<16x32xf32>
    %27 = vector.extract_strided_slice %4 {offsets = [1, 0], sizes = [16, 3], strides = [1, 1]} : vector<18x3xf32> to vector<16x3xf32>
    %c1_29 = arith.constant 1 : index
    %c1_30 = arith.constant 1 : index
    %c0_31 = arith.constant 0 : index
    %c0_32 = arith.constant 0 : index
    %28 = vector.load %arg5[%c1_29, %c1_30, %c0_31, %c0_32] : memref<3x3x3x32xf32, #tpu.memory_space<vmem>>, vector<1x1x3x32xf32>
    %29 = vector.shape_cast %28 : vector<1x1x3x32xf32> to vector<3x32xf32>
    %cst_33 = arith.constant dense<0.000000e+00> : vector<16x32xf32>
    %30 = tpu.matmul %27, %29, %cst_33 {dimension_numbers = #tpu.dot_dimension_numbers<[1], [0], [0], [1], [0, 0, 1, 1], [], []>} : vector<16x3xf32>, vector<3x32xf32>, vector<16x32xf32> -> vector<16x32xf32>
    %31 = arith.addf %26, %30 : vector<16x32xf32>
    %32 = vector.extract_strided_slice %4 {offsets = [2, 0], sizes = [16, 3], strides = [1, 1]} : vector<18x3xf32> to vector<16x3xf32>
    %c1_34 = arith.constant 1 : index
    %c2_35 = arith.constant 2 : index
    %c0_36 = arith.constant 0 : index
    %c0_37 = arith.constant 0 : index
    %33 = vector.load %arg5[%c1_34, %c2_35, %c0_36, %c0_37] : memref<3x3x3x32xf32, #tpu.memory_space<vmem>>, vector<1x1x3x32xf32>
    %34 = vector.shape_cast %33 : vector<1x1x3x32xf32> to vector<3x32xf32>
    %cst_38 = arith.constant dense<0.000000e+00> : vector<16x32xf32>
    %35 = tpu.matmul %32, %34, %cst_38 {dimension_numbers = #tpu.dot_dimension_numbers<[1], [0], [0], [1], [0, 0, 1, 1], [], []>} : vector<16x3xf32>, vector<3x32xf32>, vector<16x32xf32> -> vector<16x32xf32>
    %36 = arith.addf %31, %35 : vector<16x32xf32>
    %37 = vector.extract_strided_slice %6 {offsets = [0, 0], sizes = [16, 3], strides = [1, 1]} : vector<18x3xf32> to vector<16x3xf32>
    %c2_39 = arith.constant 2 : index
    %c0_40 = arith.constant 0 : index
    %c0_41 = arith.constant 0 : index
    %c0_42 = arith.constant 0 : index
    %38 = vector.load %arg5[%c2_39, %c0_40, %c0_41, %c0_42] : memref<3x3x3x32xf32, #tpu.memory_space<vmem>>, vector<1x1x3x32xf32>
    %39 = vector.shape_cast %38 : vector<1x1x3x32xf32> to vector<3x32xf32>
    %cst_43 = arith.constant dense<0.000000e+00> : vector<16x32xf32>
    %40 = tpu.matmul %37, %39, %cst_43 {dimension_numbers = #tpu.dot_dimension_numbers<[1], [0], [0], [1], [0, 0, 1, 1], [], []>} : vector<16x3xf32>, vector<3x32xf32>, vector<16x32xf32> -> vector<16x32xf32>
    %41 = arith.addf %36, %40 : vector<16x32xf32>
    %42 = vector.extract_strided_slice %6 {offsets = [1, 0], sizes = [16, 3], strides = [1, 1]} : vector<18x3xf32> to vector<16x3xf32>
    %c2_44 = arith.constant 2 : index
    %c1_45 = arith.constant 1 : index
    %c0_46 = arith.constant 0 : index
    %c0_47 = arith.constant 0 : index
    %43 = vector.load %arg5[%c2_44, %c1_45, %c0_46, %c0_47] : memref<3x3x3x32xf32, #tpu.memory_space<vmem>>, vector<1x1x3x32xf32>
    %44 = vector.shape_cast %43 : vector<1x1x3x32xf32> to vector<3x32xf32>
    %cst_48 = arith.constant dense<0.000000e+00> : vector<16x32xf32>
    %45 = tpu.matmul %42, %44, %cst_48 {dimension_numbers = #tpu.dot_dimension_numbers<[1], [0], [0], [1], [0, 0, 1, 1], [], []>} : vector<16x3xf32>, vector<3x32xf32>, vector<16x32xf32> -> vector<16x32xf32>
    %46 = arith.addf %41, %45 : vector<16x32xf32>
    %47 = vector.extract_strided_slice %6 {offsets = [2, 0], sizes = [16, 3], strides = [1, 1]} : vector<18x3xf32> to vector<16x3xf32>
    %c2_49 = arith.constant 2 : index
    %c2_50 = arith.constant 2 : index
    %c0_51 = arith.constant 0 : index
    %c0_52 = arith.constant 0 : index
    %48 = vector.load %arg5[%c2_49, %c2_50, %c0_51, %c0_52] : memref<3x3x3x32xf32, #tpu.memory_space<vmem>>, vector<1x1x3x32xf32>
    %49 = vector.shape_cast %48 : vector<1x1x3x32xf32> to vector<3x32xf32>
    %cst_53 = arith.constant dense<0.000000e+00> : vector<16x32xf32>
    %50 = tpu.matmul %47, %49, %cst_53 {dimension_numbers = #tpu.dot_dimension_numbers<[1], [0], [0], [1], [0, 0, 1, 1], [], []>} : vector<16x3xf32>, vector<3x32xf32>, vector<16x32xf32> -> vector<16x32xf32>
    %51 = arith.addf %46, %50 : vector<16x32xf32>
    %c0_54 = arith.constant 0 : index
    %c0_55 = arith.constant 0 : index
    %52 = vector.load %arg6[%c0_54, %c0_55] : memref<1x32xf32, #tpu.memory_space<vmem>>, vector<1x32xf32>
    %53 = vector.broadcast %52 : vector<1x32xf32> to vector<16x32xf32>
    %54 = arith.addf %51, %53 : vector<16x32xf32>
    %cst_56 = arith.constant 0.000000e+00 : f32
    %55 = vector.broadcast %cst_56 : f32 to vector<16x32xf32>
    %56 = arith.maximumf %54, %55 : vector<16x32xf32>
    %57 = arith.truncf %56 : vector<16x32xf32> to vector<16x32xbf16>
    %c0_57 = arith.constant 0 : index
    %c0_58 = arith.constant 0 : index
    %c0_59 = arith.constant 0 : index
    %c0_60 = arith.constant 0 : index
    %58 = vector.load %arg7[%c0_57, %c0_58, %c0_59, %c0_60] : memref<1x1x16x32xbf16, #tpu.memory_space<vmem>>, vector<1x1x16x32xbf16>
    %59 = vector.shape_cast %58 : vector<1x1x16x32xbf16> to vector<16x32xbf16>
    %60 = vector.shape_cast %57 : vector<16x32xbf16> to vector<1x1x16x32xbf16>
    tpu.vector_store %arg7[%c0_57, %c0_58, %c0_59, %c0_60], %60 {strides = array<i32>} : memref<1x1x16x32xbf16, #tpu.memory_space<vmem>>, vector<1x1x16x32xbf16>,
    return
  }
  func.func @transform_0(%arg0: i32, %arg1: i32) -> (i32, i32, i32, i32) {
    %c0_i32 = arith.constant 0 : i32
    %c0_i32_0 = arith.constant 0 : i32
    %c0_i32_1 = arith.constant 0 : i32
    return %arg0, %arg1, %c0_i32, %c0_i32_0 : i32, i32, i32, i32
  }
  func.func @transform_1(%arg0: i32, %arg1: i32) -> (i32, i32, i32, i32) {
    %c1_i32 = arith.constant 1 : i32
    %0 = arith.addi %arg1, %c1_i32 : i32
    %c0_i32 = arith.constant 0 : i32
    %c0_i32_0 = arith.constant 0 : i32
    %c0_i32_1 = arith.constant 0 : i32
    return %arg0, %0, %c0_i32, %c0_i32_0 : i32, i32, i32, i32
  }
  func.func @transform_2(%arg0: i32, %arg1: i32) -> (i32, i32, i32, i32) {
    %c2_i32 = arith.constant 2 : i32
    %0 = arith.addi %arg1, %c2_i32 : i32
    %c0_i32 = arith.constant 0 : i32
    %c0_i32_0 = arith.constant 0 : i32
    %c0_i32_1 = arith.constant 0 : i32
    return %arg0, %0, %c0_i32, %c0_i32_0 : i32, i32, i32, i32
  }
  func.func @transform_3(%arg0: i32, %arg1: i32) -> (i32, i32, i32, i32) {
    %c0_i32 = arith.constant 0 : i32
    %c0_i32_0 = arith.constant 0 : i32
    %c0_i32_1 = arith.constant 0 : i32
    %c0_i32_2 = arith.constant 0 : i32
    %c0_i32_3 = arith.constant 0 : i32
    return %c0_i32, %c0_i32_0, %c0_i32_1, %c0_i32_2 : i32, i32, i32, i32
  }
  func.func @transform_4(%arg0: i32, %arg1: i32) -> (i32, i32) {
    %c0_i32 = arith.constant 0 : i32
    %c0_i32_0 = arith.constant 0 : i32
    %c0_i32_1 = arith.constant 0 : i32
    return %c0_i32, %c0_i32_0 : i32, i32
  }
  func.func @transform_5(%arg0: i32, %arg1: i32) -> (i32, i32, i32, i32) {
    %c0_i32 = arith.constant 0 : i32
    %c0_i32_0 = arith.constant 0 : i32
    %c0_i32_1 = arith.constant 0 : i32
    return %arg0, %arg1, %c0_i32, %c0_i32_0 : i32, i32, i32, i32
  }
}

module attributes {stable_mosaic.version = 11 : i64} {
  func.func @_conv3x3_row_kernel(%arg0: i32, %arg1: i32, %arg2: memref<1x1x18x32xbf16, #tpu.memory_space<vmem>>, %arg3: memref<1x1x18x32xbf16, #tpu.memory_space<vmem>>, %arg4: memref<1x1x18x32xbf16, #tpu.memory_space<vmem>>, %arg5: memref<3x3x32x64xbf16, #tpu.memory_space<vmem>>, %arg6: memref<1x64xf32, #tpu.memory_space<vmem>>, %arg7: memref<1x1x16x64xbf16, #tpu.memory_space<vmem>>) attributes {dimension_semantics = [#tpu.dimension_semantics<parallel>, #tpu.dimension_semantics<parallel>], iteration_bounds = array<i64: 2, 16>, scalar_prefetch = 0 : i64, scratch_operands = 0 : i64, tpu.core_type = #tpu.core_type<tc>, window_params = [{transform_indices = @transform_0, window_bounds = array<i64: 1, 1, 18, 32>}, {transform_indices = @transform_1, window_bounds = array<i64: 1, 1, 18, 32>}, {transform_indices = @transform_2, window_bounds = array<i64: 1, 1, 18, 32>}, {pipeline_mode = #tpu.pipeline_mode<synchronous>, transform_indices = @transform_3, window_bounds = array<i64: 3, 3, 32, 64>}, {pipeline_mode = #tpu.pipeline_mode<synchronous>, transform_indices = @transform_4, window_bounds = array<i64: 1, 64>}, {transform_indices = @transform_5, window_bounds = array<i64: 1, 1, 16, 64>}]} {
    %cst = arith.constant 0.000000e+00 : f32
    %0 = vector.broadcast %cst : f32 to vector<16x64xf32>
    %c0 = arith.constant 0 : index
    %c0_0 = arith.constant 0 : index
    %c0_1 = arith.constant 0 : index
    %c0_2 = arith.constant 0 : index
    %1 = vector.load %arg2[%c0, %c0_0, %c0_1, %c0_2] : memref<1x1x18x32xbf16, #tpu.memory_space<vmem>>, vector<1x1x18x32xbf16>
    %2 = vector.shape_cast %1 : vector<1x1x18x32xbf16> to vector<18x32xbf16>
    %c0_3 = arith.constant 0 : index
    %c0_4 = arith.constant 0 : index
    %c0_5 = arith.constant 0 : index
    %c0_6 = arith.constant 0 : index
    %3 = vector.load %arg3[%c0_3, %c0_4, %c0_5, %c0_6] : memref<1x1x18x32xbf16, #tpu.memory_space<vmem>>, vector<1x1x18x32xbf16>
    %4 = vector.shape_cast %3 : vector<1x1x18x32xbf16> to vector<18x32xbf16>
    %c0_7 = arith.constant 0 : index
    %c0_8 = arith.constant 0 : index
    %c0_9 = arith.constant 0 : index
    %c0_10 = arith.constant 0 : index
    %5 = vector.load %arg4[%c0_7, %c0_8, %c0_9, %c0_10] : memref<1x1x18x32xbf16, #tpu.memory_space<vmem>>, vector<1x1x18x32xbf16>
    %6 = vector.shape_cast %5 : vector<1x1x18x32xbf16> to vector<18x32xbf16>
    %7 = vector.extract_strided_slice %2 {offsets = [0, 0], sizes = [16, 32], strides = [1, 1]} : vector<18x32xbf16> to vector<16x32xbf16>
    %c0_11 = arith.constant 0 : index
    %c0_12 = arith.constant 0 : index
    %c0_13 = arith.constant 0 : index
    %c0_14 = arith.constant 0 : index
    %8 = vector.load %arg5[%c0_11, %c0_12, %c0_13, %c0_14] : memref<3x3x32x64xbf16, #tpu.memory_space<vmem>>, vector<1x1x32x64xbf16>
    %9 = vector.shape_cast %8 : vector<1x1x32x64xbf16> to vector<32x64xbf16>
    %cst_15 = arith.constant dense<0.000000e+00> : vector<16x64xf32>
    %10 = tpu.matmul %7, %9, %cst_15 {dimension_numbers = #tpu.dot_dimension_numbers<[1], [0], [0], [1], [0, 0, 1, 1], [], []>} : vector<16x32xbf16>, vector<32x64xbf16>, vector<16x64xf32> -> vector<16x64xf32>
    %11 = arith.addf %0, %10 : vector<16x64xf32>
    %12 = vector.extract_strided_slice %2 {offsets = [1, 0], sizes = [16, 32], strides = [1, 1]} : vector<18x32xbf16> to vector<16x32xbf16>
    %c0_16 = arith.constant 0 : index
    %c1 = arith.constant 1 : index
    %c0_17 = arith.constant 0 : index
    %c0_18 = arith.constant 0 : index
    %13 = vector.load %arg5[%c0_16, %c1, %c0_17, %c0_18] : memref<3x3x32x64xbf16, #tpu.memory_space<vmem>>, vector<1x1x32x64xbf16>
    %14 = vector.shape_cast %13 : vector<1x1x32x64xbf16> to vector<32x64xbf16>
    %cst_19 = arith.constant dense<0.000000e+00> : vector<16x64xf32>
    %15 = tpu.matmul %12, %14, %cst_19 {dimension_numbers = #tpu.dot_dimension_numbers<[1], [0], [0], [1], [0, 0, 1, 1], [], []>} : vector<16x32xbf16>, vector<32x64xbf16>, vector<16x64xf32> -> vector<16x64xf32>
    %16 = arith.addf %11, %15 : vector<16x64xf32>
    %17 = vector.extract_strided_slice %2 {offsets = [2, 0], sizes = [16, 32], strides = [1, 1]} : vector<18x32xbf16> to vector<16x32xbf16>
    %c0_20 = arith.constant 0 : index
    %c2 = arith.constant 2 : index
    %c0_21 = arith.constant 0 : index
    %c0_22 = arith.constant 0 : index
    %18 = vector.load %arg5[%c0_20, %c2, %c0_21, %c0_22] : memref<3x3x32x64xbf16, #tpu.memory_space<vmem>>, vector<1x1x32x64xbf16>
    %19 = vector.shape_cast %18 : vector<1x1x32x64xbf16> to vector<32x64xbf16>
    %cst_23 = arith.constant dense<0.000000e+00> : vector<16x64xf32>
    %20 = tpu.matmul %17, %19, %cst_23 {dimension_numbers = #tpu.dot_dimension_numbers<[1], [0], [0], [1], [0, 0, 1, 1], [], []>} : vector<16x32xbf16>, vector<32x64xbf16>, vector<16x64xf32> -> vector<16x64xf32>
    %21 = arith.addf %16, %20 : vector<16x64xf32>
    %22 = vector.extract_strided_slice %4 {offsets = [0, 0], sizes = [16, 32], strides = [1, 1]} : vector<18x32xbf16> to vector<16x32xbf16>
    %c1_24 = arith.constant 1 : index
    %c0_25 = arith.constant 0 : index
    %c0_26 = arith.constant 0 : index
    %c0_27 = arith.constant 0 : index
    %23 = vector.load %arg5[%c1_24, %c0_25, %c0_26, %c0_27] : memref<3x3x32x64xbf16, #tpu.memory_space<vmem>>, vector<1x1x32x64xbf16>
    %24 = vector.shape_cast %23 : vector<1x1x32x64xbf16> to vector<32x64xbf16>
    %cst_28 = arith.constant dense<0.000000e+00> : vector<16x64xf32>
    %25 = tpu.matmul %22, %24, %cst_28 {dimension_numbers = #tpu.dot_dimension_numbers<[1], [0], [0], [1], [0, 0, 1, 1], [], []>} : vector<16x32xbf16>, vector<32x64xbf16>, vector<16x64xf32> -> vector<16x64xf32>
    %26 = arith.addf %21, %25 : vector<16x64xf32>
    %27 = vector.extract_strided_slice %4 {offsets = [1, 0], sizes = [16, 32], strides = [1, 1]} : vector<18x32xbf16> to vector<16x32xbf16>
    %c1_29 = arith.constant 1 : index
    %c1_30 = arith.constant 1 : index
    %c0_31 = arith.constant 0 : index
    %c0_32 = arith.constant 0 : index
    %28 = vector.load %arg5[%c1_29, %c1_30, %c0_31, %c0_32] : memref<3x3x32x64xbf16, #tpu.memory_space<vmem>>, vector<1x1x32x64xbf16>
    %29 = vector.shape_cast %28 : vector<1x1x32x64xbf16> to vector<32x64xbf16>
    %cst_33 = arith.constant dense<0.000000e+00> : vector<16x64xf32>
    %30 = tpu.matmul %27, %29, %cst_33 {dimension_numbers = #tpu.dot_dimension_numbers<[1], [0], [0], [1], [0, 0, 1, 1], [], []>} : vector<16x32xbf16>, vector<32x64xbf16>, vector<16x64xf32> -> vector<16x64xf32>
    %31 = arith.addf %26, %30 : vector<16x64xf32>
    %32 = vector.extract_strided_slice %4 {offsets = [2, 0], sizes = [16, 32], strides = [1, 1]} : vector<18x32xbf16> to vector<16x32xbf16>
    %c1_34 = arith.constant 1 : index
    %c2_35 = arith.constant 2 : index
    %c0_36 = arith.constant 0 : index
    %c0_37 = arith.constant 0 : index
    %33 = vector.load %arg5[%c1_34, %c2_35, %c0_36, %c0_37] : memref<3x3x32x64xbf16, #tpu.memory_space<vmem>>, vector<1x1x32x64xbf16>
    %34 = vector.shape_cast %33 : vector<1x1x32x64xbf16> to vector<32x64xbf16>
    %cst_38 = arith.constant dense<0.000000e+00> : vector<16x64xf32>
    %35 = tpu.matmul %32, %34, %cst_38 {dimension_numbers = #tpu.dot_dimension_numbers<[1], [0], [0], [1], [0, 0, 1, 1], [], []>} : vector<16x32xbf16>, vector<32x64xbf16>, vector<16x64xf32> -> vector<16x64xf32>
    %36 = arith.addf %31, %35 : vector<16x64xf32>
    %37 = vector.extract_strided_slice %6 {offsets = [0, 0], sizes = [16, 32], strides = [1, 1]} : vector<18x32xbf16> to vector<16x32xbf16>
    %c2_39 = arith.constant 2 : index
    %c0_40 = arith.constant 0 : index
    %c0_41 = arith.constant 0 : index
    %c0_42 = arith.constant 0 : index
    %38 = vector.load %arg5[%c2_39, %c0_40, %c0_41, %c0_42] : memref<3x3x32x64xbf16, #tpu.memory_space<vmem>>, vector<1x1x32x64xbf16>
    %39 = vector.shape_cast %38 : vector<1x1x32x64xbf16> to vector<32x64xbf16>
    %cst_43 = arith.constant dense<0.000000e+00> : vector<16x64xf32>
    %40 = tpu.matmul %37, %39, %cst_43 {dimension_numbers = #tpu.dot_dimension_numbers<[1], [0], [0], [1], [0, 0, 1, 1], [], []>} : vector<16x32xbf16>, vector<32x64xbf16>, vector<16x64xf32> -> vector<16x64xf32>
    %41 = arith.addf %36, %40 : vector<16x64xf32>
    %42 = vector.extract_strided_slice %6 {offsets = [1, 0], sizes = [16, 32], strides = [1, 1]} : vector<18x32xbf16> to vector<16x32xbf16>
    %c2_44 = arith.constant 2 : index
    %c1_45 = arith.constant 1 : index
    %c0_46 = arith.constant 0 : index
    %c0_47 = arith.constant 0 : index
    %43 = vector.load %arg5[%c2_44, %c1_45, %c0_46, %c0_47] : memref<3x3x32x64xbf16, #tpu.memory_space<vmem>>, vector<1x1x32x64xbf16>
    %44 = vector.shape_cast %43 : vector<1x1x32x64xbf16> to vector<32x64xbf16>
    %cst_48 = arith.constant dense<0.000000e+00> : vector<16x64xf32>
    %45 = tpu.matmul %42, %44, %cst_48 {dimension_numbers = #tpu.dot_dimension_numbers<[1], [0], [0], [1], [0, 0, 1, 1], [], []>} : vector<16x32xbf16>, vector<32x64xbf16>, vector<16x64xf32> -> vector<16x64xf32>
    %46 = arith.addf %41, %45 : vector<16x64xf32>
    %47 = vector.extract_strided_slice %6 {offsets = [2, 0], sizes = [16, 32], strides = [1, 1]} : vector<18x32xbf16> to vector<16x32xbf16>
    %c2_49 = arith.constant 2 : index
    %c2_50 = arith.constant 2 : index
    %c0_51 = arith.constant 0 : index
    %c0_52 = arith.constant 0 : index
    %48 = vector.load %arg5[%c2_49, %c2_50, %c0_51, %c0_52] : memref<3x3x32x64xbf16, #tpu.memory_space<vmem>>, vector<1x1x32x64xbf16>
    %49 = vector.shape_cast %48 : vector<1x1x32x64xbf16> to vector<32x64xbf16>
    %cst_53 = arith.constant dense<0.000000e+00> : vector<16x64xf32>
    %50 = tpu.matmul %47, %49, %cst_53 {dimension_numbers = #tpu.dot_dimension_numbers<[1], [0], [0], [1], [0, 0, 1, 1], [], []>} : vector<16x32xbf16>, vector<32x64xbf16>, vector<16x64xf32> -> vector<16x64xf32>
    %51 = arith.addf %46, %50 : vector<16x64xf32>
    %c0_54 = arith.constant 0 : index
    %c0_55 = arith.constant 0 : index
    %52 = vector.load %arg6[%c0_54, %c0_55] : memref<1x64xf32, #tpu.memory_space<vmem>>, vector<1x64xf32>
    %53 = vector.broadcast %52 : vector<1x64xf32> to vector<16x64xf32>
    %54 = arith.addf %51, %53 : vector<16x64xf32>
    %cst_56 = arith.constant 0.000000e+00 : f32
    %55 = vector.broadcast %cst_56 : f32 to vector<16x64xf32>
    %56 = arith.maximumf %54, %55 : vector<16x64xf32>
    %57 = arith.truncf %56 : vector<16x64xf32> to vector<16x64xbf16>
    %c0_57 = arith.constant 0 : index
    %c0_58 = arith.constant 0 : index
    %c0_59 = arith.constant 0 : index
    %c0_60 = arith.constant 0 : index
    %58 = vector.load %arg7[%c0_57, %c0_58, %c0_59, %c0_60] : memref<1x1x16x64xbf16, #tpu.memory_space<vmem>>, vector<1x1x16x64xbf16>
    %59 = vector.shape_cast %58 : vector<1x1x16x64xbf16> to vector<16x64xbf16>
    %60 = vector.shape_cast %57 : vector<16x64xbf16> to vector<1x1x16x64xbf16>
    tpu.vector_store %arg7[%c0_57, %c0_58, %c0_59, %c0_60], %60 {strides = array<i32>} : memref<1x1x16x64xbf16, #tpu.memory_space<vmem>>, vector<1x1x16x64xbf16>,
    return
  }
  func.func @transform_0(%arg0: i32, %arg1: i32) -> (i32, i32, i32, i32) {
    %c0_i32 = arith.constant 0 : i32
    %c0_i32_0 = arith.constant 0 : i32
    %c0_i32_1 = arith.constant 0 : i32
    return %arg0, %arg1, %c0_i32, %c0_i32_0 : i32, i32, i32, i32
  }
  func.func @transform_1(%arg0: i32, %arg1: i32) -> (i32, i32, i32, i32) {
    %c1_i32 = arith.constant 1 : i32
    %0 = arith.addi %arg1, %c1_i32 : i32
    %c0_i32 = arith.constant 0 : i32
    %c0_i32_0 = arith.constant 0 : i32
    %c0_i32_1 = arith.constant 0 : i32
    return %arg0, %0, %c0_i32, %c0_i32_0 : i32, i32, i32, i32
  }
  func.func @transform_2(%arg0: i32, %arg1: i32) -> (i32, i32, i32, i32) {
    %c2_i32 = arith.constant 2 : i32
    %0 = arith.addi %arg1, %c2_i32 : i32
    %c0_i32 = arith.constant 0 : i32
    %c0_i32_0 = arith.constant 0 : i32
    %c0_i32_1 = arith.constant 0 : i32
    return %arg0, %0, %c0_i32, %c0_i32_0 : i32, i32, i32, i32
  }
  func.func @transform_3(%arg0: i32, %arg1: i32) -> (i32, i32, i32, i32) {
    %c0_i32 = arith.constant 0 : i32
    %c0_i32_0 = arith.constant 0 : i32
    %c0_i32_1 = arith.constant 0 : i32
    %c0_i32_2 = arith.constant 0 : i32
    %c0_i32_3 = arith.constant 0 : i32
    return %c0_i32, %c0_i32_0, %c0_i32_1, %c0_i32_2 : i32, i32, i32, i32
  }
  func.func @transform_4(%arg0: i32, %arg1: i32) -> (i32, i32) {
    %c0_i32 = arith.constant 0 : i32
    %c0_i32_0 = arith.constant 0 : i32
    %c0_i32_1 = arith.constant 0 : i32
    return %c0_i32, %c0_i32_0 : i32, i32
  }
  func.func @transform_5(%arg0: i32, %arg1: i32) -> (i32, i32, i32, i32) {
    %c0_i32 = arith.constant 0 : i32
    %c0_i32_0 = arith.constant 0 : i32
    %c0_i32_1 = arith.constant 0 : i32
    return %arg0, %arg1, %c0_i32, %c0_i32_0 : i32, i32, i32, i32
  }
}

module attributes {stable_mosaic.version = 11 : i64} {
  func.func @_conv3x3_row_kernel(%arg0: i32, %arg1: i32, %arg2: memref<1x1x18x64xbf16, #tpu.memory_space<vmem>>, %arg3: memref<1x1x18x64xbf16, #tpu.memory_space<vmem>>, %arg4: memref<1x1x18x64xbf16, #tpu.memory_space<vmem>>, %arg5: memref<3x3x64x9xbf16, #tpu.memory_space<vmem>>, %arg6: memref<1x9xf32, #tpu.memory_space<vmem>>, %arg7: memref<1x1x16x9xf32, #tpu.memory_space<vmem>>) attributes {dimension_semantics = [#tpu.dimension_semantics<parallel>, #tpu.dimension_semantics<parallel>], iteration_bounds = array<i64: 2, 16>, scalar_prefetch = 0 : i64, scratch_operands = 0 : i64, tpu.core_type = #tpu.core_type<tc>, window_params = [{transform_indices = @transform_0, window_bounds = array<i64: 1, 1, 18, 64>}, {transform_indices = @transform_1, window_bounds = array<i64: 1, 1, 18, 64>}, {transform_indices = @transform_2, window_bounds = array<i64: 1, 1, 18, 64>}, {pipeline_mode = #tpu.pipeline_mode<synchronous>, transform_indices = @transform_3, window_bounds = array<i64: 3, 3, 64, 9>}, {pipeline_mode = #tpu.pipeline_mode<synchronous>, transform_indices = @transform_4, window_bounds = array<i64: 1, 9>}, {transform_indices = @transform_5, window_bounds = array<i64: 1, 1, 16, 9>}]} {
    %cst = arith.constant 0.000000e+00 : f32
    %0 = vector.broadcast %cst : f32 to vector<16x9xf32>
    %c0 = arith.constant 0 : index
    %c0_0 = arith.constant 0 : index
    %c0_1 = arith.constant 0 : index
    %c0_2 = arith.constant 0 : index
    %1 = vector.load %arg2[%c0, %c0_0, %c0_1, %c0_2] : memref<1x1x18x64xbf16, #tpu.memory_space<vmem>>, vector<1x1x18x64xbf16>
    %2 = vector.shape_cast %1 : vector<1x1x18x64xbf16> to vector<18x64xbf16>
    %c0_3 = arith.constant 0 : index
    %c0_4 = arith.constant 0 : index
    %c0_5 = arith.constant 0 : index
    %c0_6 = arith.constant 0 : index
    %3 = vector.load %arg3[%c0_3, %c0_4, %c0_5, %c0_6] : memref<1x1x18x64xbf16, #tpu.memory_space<vmem>>, vector<1x1x18x64xbf16>
    %4 = vector.shape_cast %3 : vector<1x1x18x64xbf16> to vector<18x64xbf16>
    %c0_7 = arith.constant 0 : index
    %c0_8 = arith.constant 0 : index
    %c0_9 = arith.constant 0 : index
    %c0_10 = arith.constant 0 : index
    %5 = vector.load %arg4[%c0_7, %c0_8, %c0_9, %c0_10] : memref<1x1x18x64xbf16, #tpu.memory_space<vmem>>, vector<1x1x18x64xbf16>
    %6 = vector.shape_cast %5 : vector<1x1x18x64xbf16> to vector<18x64xbf16>
    %7 = vector.extract_strided_slice %2 {offsets = [0, 0], sizes = [16, 64], strides = [1, 1]} : vector<18x64xbf16> to vector<16x64xbf16>
    %c0_11 = arith.constant 0 : index
    %c0_12 = arith.constant 0 : index
    %c0_13 = arith.constant 0 : index
    %c0_14 = arith.constant 0 : index
    %8 = vector.load %arg5[%c0_11, %c0_12, %c0_13, %c0_14] : memref<3x3x64x9xbf16, #tpu.memory_space<vmem>>, vector<1x1x64x9xbf16>
    %9 = vector.shape_cast %8 : vector<1x1x64x9xbf16> to vector<64x9xbf16>
    %cst_15 = arith.constant dense<0.000000e+00> : vector<16x9xf32>
    %10 = tpu.matmul %7, %9, %cst_15 {dimension_numbers = #tpu.dot_dimension_numbers<[1], [0], [0], [1], [0, 0, 1, 1], [], []>} : vector<16x64xbf16>, vector<64x9xbf16>, vector<16x9xf32> -> vector<16x9xf32>
    %11 = arith.addf %0, %10 : vector<16x9xf32>
    %12 = vector.extract_strided_slice %2 {offsets = [1, 0], sizes = [16, 64], strides = [1, 1]} : vector<18x64xbf16> to vector<16x64xbf16>
    %c0_16 = arith.constant 0 : index
    %c1 = arith.constant 1 : index
    %c0_17 = arith.constant 0 : index
    %c0_18 = arith.constant 0 : index
    %13 = vector.load %arg5[%c0_16, %c1, %c0_17, %c0_18] : memref<3x3x64x9xbf16, #tpu.memory_space<vmem>>, vector<1x1x64x9xbf16>
    %14 = vector.shape_cast %13 : vector<1x1x64x9xbf16> to vector<64x9xbf16>
    %cst_19 = arith.constant dense<0.000000e+00> : vector<16x9xf32>
    %15 = tpu.matmul %12, %14, %cst_19 {dimension_numbers = #tpu.dot_dimension_numbers<[1], [0], [0], [1], [0, 0, 1, 1], [], []>} : vector<16x64xbf16>, vector<64x9xbf16>, vector<16x9xf32> -> vector<16x9xf32>
    %16 = arith.addf %11, %15 : vector<16x9xf32>
    %17 = vector.extract_strided_slice %2 {offsets = [2, 0], sizes = [16, 64], strides = [1, 1]} : vector<18x64xbf16> to vector<16x64xbf16>
    %c0_20 = arith.constant 0 : index
    %c2 = arith.constant 2 : index
    %c0_21 = arith.constant 0 : index
    %c0_22 = arith.constant 0 : index
    %18 = vector.load %arg5[%c0_20, %c2, %c0_21, %c0_22] : memref<3x3x64x9xbf16, #tpu.memory_space<vmem>>, vector<1x1x64x9xbf16>
    %19 = vector.shape_cast %18 : vector<1x1x64x9xbf16> to vector<64x9xbf16>
    %cst_23 = arith.constant dense<0.000000e+00> : vector<16x9xf32>
    %20 = tpu.matmul %17, %19, %cst_23 {dimension_numbers = #tpu.dot_dimension_numbers<[1], [0], [0], [1], [0, 0, 1, 1], [], []>} : vector<16x64xbf16>, vector<64x9xbf16>, vector<16x9xf32> -> vector<16x9xf32>
    %21 = arith.addf %16, %20 : vector<16x9xf32>
    %22 = vector.extract_strided_slice %4 {offsets = [0, 0], sizes = [16, 64], strides = [1, 1]} : vector<18x64xbf16> to vector<16x64xbf16>
    %c1_24 = arith.constant 1 : index
    %c0_25 = arith.constant 0 : index
    %c0_26 = arith.constant 0 : index
    %c0_27 = arith.constant 0 : index
    %23 = vector.load %arg5[%c1_24, %c0_25, %c0_26, %c0_27] : memref<3x3x64x9xbf16, #tpu.memory_space<vmem>>, vector<1x1x64x9xbf16>
    %24 = vector.shape_cast %23 : vector<1x1x64x9xbf16> to vector<64x9xbf16>
    %cst_28 = arith.constant dense<0.000000e+00> : vector<16x9xf32>
    %25 = tpu.matmul %22, %24, %cst_28 {dimension_numbers = #tpu.dot_dimension_numbers<[1], [0], [0], [1], [0, 0, 1, 1], [], []>} : vector<16x64xbf16>, vector<64x9xbf16>, vector<16x9xf32> -> vector<16x9xf32>
    %26 = arith.addf %21, %25 : vector<16x9xf32>
    %27 = vector.extract_strided_slice %4 {offsets = [1, 0], sizes = [16, 64], strides = [1, 1]} : vector<18x64xbf16> to vector<16x64xbf16>
    %c1_29 = arith.constant 1 : index
    %c1_30 = arith.constant 1 : index
    %c0_31 = arith.constant 0 : index
    %c0_32 = arith.constant 0 : index
    %28 = vector.load %arg5[%c1_29, %c1_30, %c0_31, %c0_32] : memref<3x3x64x9xbf16, #tpu.memory_space<vmem>>, vector<1x1x64x9xbf16>
    %29 = vector.shape_cast %28 : vector<1x1x64x9xbf16> to vector<64x9xbf16>
    %cst_33 = arith.constant dense<0.000000e+00> : vector<16x9xf32>
    %30 = tpu.matmul %27, %29, %cst_33 {dimension_numbers = #tpu.dot_dimension_numbers<[1], [0], [0], [1], [0, 0, 1, 1], [], []>} : vector<16x64xbf16>, vector<64x9xbf16>, vector<16x9xf32> -> vector<16x9xf32>
    %31 = arith.addf %26, %30 : vector<16x9xf32>
    %32 = vector.extract_strided_slice %4 {offsets = [2, 0], sizes = [16, 64], strides = [1, 1]} : vector<18x64xbf16> to vector<16x64xbf16>
    %c1_34 = arith.constant 1 : index
    %c2_35 = arith.constant 2 : index
    %c0_36 = arith.constant 0 : index
    %c0_37 = arith.constant 0 : index
    %33 = vector.load %arg5[%c1_34, %c2_35, %c0_36, %c0_37] : memref<3x3x64x9xbf16, #tpu.memory_space<vmem>>, vector<1x1x64x9xbf16>
    %34 = vector.shape_cast %33 : vector<1x1x64x9xbf16> to vector<64x9xbf16>
    %cst_38 = arith.constant dense<0.000000e+00> : vector<16x9xf32>
    %35 = tpu.matmul %32, %34, %cst_38 {dimension_numbers = #tpu.dot_dimension_numbers<[1], [0], [0], [1], [0, 0, 1, 1], [], []>} : vector<16x64xbf16>, vector<64x9xbf16>, vector<16x9xf32> -> vector<16x9xf32>
    %36 = arith.addf %31, %35 : vector<16x9xf32>
    %37 = vector.extract_strided_slice %6 {offsets = [0, 0], sizes = [16, 64], strides = [1, 1]} : vector<18x64xbf16> to vector<16x64xbf16>
    %c2_39 = arith.constant 2 : index
    %c0_40 = arith.constant 0 : index
    %c0_41 = arith.constant 0 : index
    %c0_42 = arith.constant 0 : index
    %38 = vector.load %arg5[%c2_39, %c0_40, %c0_41, %c0_42] : memref<3x3x64x9xbf16, #tpu.memory_space<vmem>>, vector<1x1x64x9xbf16>
    %39 = vector.shape_cast %38 : vector<1x1x64x9xbf16> to vector<64x9xbf16>
    %cst_43 = arith.constant dense<0.000000e+00> : vector<16x9xf32>
    %40 = tpu.matmul %37, %39, %cst_43 {dimension_numbers = #tpu.dot_dimension_numbers<[1], [0], [0], [1], [0, 0, 1, 1], [], []>} : vector<16x64xbf16>, vector<64x9xbf16>, vector<16x9xf32> -> vector<16x9xf32>
    %41 = arith.addf %36, %40 : vector<16x9xf32>
    %42 = vector.extract_strided_slice %6 {offsets = [1, 0], sizes = [16, 64], strides = [1, 1]} : vector<18x64xbf16> to vector<16x64xbf16>
    %c2_44 = arith.constant 2 : index
    %c1_45 = arith.constant 1 : index
    %c0_46 = arith.constant 0 : index
    %c0_47 = arith.constant 0 : index
    %43 = vector.load %arg5[%c2_44, %c1_45, %c0_46, %c0_47] : memref<3x3x64x9xbf16, #tpu.memory_space<vmem>>, vector<1x1x64x9xbf16>
    %44 = vector.shape_cast %43 : vector<1x1x64x9xbf16> to vector<64x9xbf16>
    %cst_48 = arith.constant dense<0.000000e+00> : vector<16x9xf32>
    %45 = tpu.matmul %42, %44, %cst_48 {dimension_numbers = #tpu.dot_dimension_numbers<[1], [0], [0], [1], [0, 0, 1, 1], [], []>} : vector<16x64xbf16>, vector<64x9xbf16>, vector<16x9xf32> -> vector<16x9xf32>
    %46 = arith.addf %41, %45 : vector<16x9xf32>
    %47 = vector.extract_strided_slice %6 {offsets = [2, 0], sizes = [16, 64], strides = [1, 1]} : vector<18x64xbf16> to vector<16x64xbf16>
    %c2_49 = arith.constant 2 : index
    %c2_50 = arith.constant 2 : index
    %c0_51 = arith.constant 0 : index
    %c0_52 = arith.constant 0 : index
    %48 = vector.load %arg5[%c2_49, %c2_50, %c0_51, %c0_52] : memref<3x3x64x9xbf16, #tpu.memory_space<vmem>>, vector<1x1x64x9xbf16>
    %49 = vector.shape_cast %48 : vector<1x1x64x9xbf16> to vector<64x9xbf16>
    %cst_53 = arith.constant dense<0.000000e+00> : vector<16x9xf32>
    %50 = tpu.matmul %47, %49, %cst_53 {dimension_numbers = #tpu.dot_dimension_numbers<[1], [0], [0], [1], [0, 0, 1, 1], [], []>} : vector<16x64xbf16>, vector<64x9xbf16>, vector<16x9xf32> -> vector<16x9xf32>
    %51 = arith.addf %46, %50 : vector<16x9xf32>
    %c0_54 = arith.constant 0 : index
    %c0_55 = arith.constant 0 : index
    %52 = vector.load %arg6[%c0_54, %c0_55] : memref<1x9xf32, #tpu.memory_space<vmem>>, vector<1x9xf32>
    %53 = vector.broadcast %52 : vector<1x9xf32> to vector<16x9xf32>
    %54 = arith.addf %51, %53 : vector<16x9xf32>
    %c0_56 = arith.constant 0 : index
    %c0_57 = arith.constant 0 : index
    %c0_58 = arith.constant 0 : index
    %c0_59 = arith.constant 0 : index
    %55 = vector.load %arg7[%c0_56, %c0_57, %c0_58, %c0_59] : memref<1x1x16x9xf32, #tpu.memory_space<vmem>>, vector<1x1x16x9xf32>
    %56 = vector.shape_cast %55 : vector<1x1x16x9xf32> to vector<16x9xf32>
    %57 = vector.shape_cast %54 : vector<16x9xf32> to vector<1x1x16x9xf32>
    tpu.vector_store %arg7[%c0_56, %c0_57, %c0_58, %c0_59], %57 {strides = array<i32>} : memref<1x1x16x9xf32, #tpu.memory_space<vmem>>, vector<1x1x16x9xf32>,
    return
  }
  func.func @transform_0(%arg0: i32, %arg1: i32) -> (i32, i32, i32, i32) {
    %c0_i32 = arith.constant 0 : i32
    %c0_i32_0 = arith.constant 0 : i32
    %c0_i32_1 = arith.constant 0 : i32
    return %arg0, %arg1, %c0_i32, %c0_i32_0 : i32, i32, i32, i32
  }
  func.func @transform_1(%arg0: i32, %arg1: i32) -> (i32, i32, i32, i32) {
    %c1_i32 = arith.constant 1 : i32
    %0 = arith.addi %arg1, %c1_i32 : i32
    %c0_i32 = arith.constant 0 : i32
    %c0_i32_0 = arith.constant 0 : i32
    %c0_i32_1 = arith.constant 0 : i32
    return %arg0, %0, %c0_i32, %c0_i32_0 : i32, i32, i32, i32
  }
  func.func @transform_2(%arg0: i32, %arg1: i32) -> (i32, i32, i32, i32) {
    %c2_i32 = arith.constant 2 : i32
    %0 = arith.addi %arg1, %c2_i32 : i32
    %c0_i32 = arith.constant 0 : i32
    %c0_i32_0 = arith.constant 0 : i32
    %c0_i32_1 = arith.constant 0 : i32
    return %arg0, %0, %c0_i32, %c0_i32_0 : i32, i32, i32, i32
  }
  func.func @transform_3(%arg0: i32, %arg1: i32) -> (i32, i32, i32, i32) {
    %c0_i32 = arith.constant 0 : i32
    %c0_i32_0 = arith.constant 0 : i32
    %c0_i32_1 = arith.constant 0 : i32
    %c0_i32_2 = arith.constant 0 : i32
    %c0_i32_3 = arith.constant 0 : i32
    return %c0_i32, %c0_i32_0, %c0_i32_1, %c0_i32_2 : i32, i32, i32, i32
  }
  func.func @transform_4(%arg0: i32, %arg1: i32) -> (i32, i32) {
    %c0_i32 = arith.constant 0 : i32
    %c0_i32_0 = arith.constant 0 : i32
    %c0_i32_1 = arith.constant 0 : i32
    return %c0_i32, %c0_i32_0 : i32, i32
  }
  func.func @transform_5(%arg0: i32, %arg1: i32) -> (i32, i32, i32, i32) {
    %c0_i32 = arith.constant 0 : i32
    %c0_i32_0 = arith.constant 0 : i32
    %c0_i32_1 = arith.constant 0 : i32
    return %arg0, %arg1, %c0_i32, %c0_i32_0 : i32, i32, i32, i32
  }
}

</mosaic_0001>

<bundles_post_ra>
// kernel: meta_proposal_network_forward.3
= control target key start
LH: loop header
LB: loop body
LE: loop exit
PB: predicated region body
PF: predicated region fallthrough
CT: control target
= control target key end

     0   :  { %s1578_s18 = smov 0   ;;  %s1580_s19 = smov 0   ;;  %s1736_s0 = inlined_call_operand.vmem [shape: f32[2,18,18,3], index: 0, kind: input, shape index: {}, may-alias: {0,1,2}]   ;;  %s1737_s1 = inlined_call_operand.vmem [shape: f32[2,18,18,3], index: 1, kind: input, shape index: {}, may-alias: {0,1,2}]   ;;  %s1738_s2 = inlined_call_operand.vmem [shape: f32[2,18,18,3], index: 2, kind: input, shape index: {}, may-alias: {0,1,2}]   ;;  %s1739_s3 = inlined_call_operand.vmem [shape: f32[3,3,3,32], index: 3, kind: input, shape index: {}]   ;;  %s1740_s4 = inlined_call_operand.vmem [shape: f32[1,32], index: 4, kind: input, shape index: {}]   ;;  %s1741_s5 = inlined_call_operand.vmem [shape: bf16[2,16,16,32], index: 5, kind: output, shape index: {}]  }
   0x1   :  { %s1582_s20 = smov 0   ;;  %s1584_s21 = smov 0  }
   0x2   :  { %s1586_s22 = smov 0  }
   0x3 LB: > { %s24_s23 = sadd.s32 1, %s1538_s20  ;;  %s27_s24 = sadd.s32 1, %s1542_s21  ;;  %s1546_s22 = sphi %s1586_s22, %s15_s22   ;;  %s1542_s21 = sphi %s1584_s21, %s1746_s21   ;;  %s1538_s20 = sphi %s1582_s20, %s1745_s20   ;;  %s1534_s19 = sphi %s1580_s19, %s1744_s19   ;;  %s1530_s18 = sphi %s1578_s18, %s1743_s18  }
   0x4   : > { %p25_p0 = scmp.ge.s32.totalorder %s24_s23, 16  ;;  %p1327_p1 = scmp.ge.s32.totalorder %s1546_s22, 1 }
   0x5   : > { %p247_p2 = scmp.lt.s32.totalorder %s1546_s22, 33 }
   0x6   : > { %s1748_s23 = smov (%p25_p0, %s24_s23), 0  ;;  %s1750_s24 = smov (!%p25_p0, %s27_s24), %s1542_s21 }
   0x7   : > { %p248_p3 = pnand %p1327_p1, %p247_p2  ;;  %p29_p4 = scmp.ge.s32.totalorder %s1750_s24, 2 }
   0x8   : > { %v1334_v0 = vld [vmem:[%s1739_s3 + $0x4] sm:$0x7] (!%p248_p3)  ;;  %vm369_vm0 = vcmask (!%p248_p3), 1042432   ;;  %v1349_v1 = vld [vmem:[%s1739_s3 + $0x10] sm:$0x7] (!%p248_p3)  ;;  %p303_p5 = scmp.lt.s32.totalorder (!%p248_p3), %s1534_s19, 1 }
   0x9   : > { %s1752_s24 = smov (%p29_p4, %s1750_s24), 0  ;;  %251 = sbr.rel (%p248_p3) target bundleno = 285 (0x11d), region = 40 }
   0xa   : > { %1403 = vmatprep.subr.msk.mxu1 (!%p248_p3), %vm369_vm0, %v1334_v0  ;;  %1423 = vmatprep.subr.msk.mxu0 (!%p248_p3), %vm369_vm0, %v1349_v1  ;;  %p305_p6 = scmp.lt.s32.totalorder (!%p248_p3), %s1530_s18, 17  ;;  %s312_s29 = sadd.s32 (!%p248_p3), 1, %s1530_s18  ;;  %v1353_v2 = vld [vmem:[%s1739_s3 + $0x14] sm:$0x7] (!%p248_p3)  ;;  %v352_v3 = vld [vmem:[%s1739_s3] sm:$0x7] (!%p248_p3) }
   0xb   : > { %1404 = vmatpush3.msk.msra.mxu1 (!%p248_p3), %vm369_vm0, %v1334_v0  ;;  %1424 = vmatpush3.msk.msra.mxu0 (!%p248_p3), %vm369_vm0, %v1349_v1  ;;  %p315_p7 = scmp.lt.s32.totalorder (!%p248_p3), %s312_s29, 17  ;;  %s323_s12 = sadd.s32 (!%p248_p3), 2, %s1530_s18  ;;  %vm358_vm1 = vcmask (!%p248_p3), 1046528   ;;  %vm364_vm2 = vcmask (!%p248_p3), 23552   ;;  %vm532_vm3 = vcmask (!%p248_p3), 1045504   ;;  %vm1183_vm4 = vcmask (!%p248_p3), 257024  }
   0xc   : > { %1428 = vmatprep.subr.msk.mxu0 (!%p248_p3), %vm369_vm0, %v1353_v2  ;;  %1408 = vmatprep.subr.msk.mxu1 (!%p248_p3), %vm369_vm0, %v352_v3  ;;  %p1641_p8 = scmp.lt.s32.totalorder (!%p248_p3), %s323_s12, 17  ;;  %v1341_v18 = vld [vmem:[%s1739_s3 + $0x8] sm:$0x7] (!%p248_p3)  ;;  %v1357_v24 = vld [vmem:[%s1739_s3 + $0x18] sm:$0x7] (!%p248_p3)  ;;  %p336_p9 = scmp.lt.s32.totalorder (!%p248_p3), %s1530_s18, 15 }
   0xd   : > { %v1345_v29 = vld [vmem:[%s1739_s3 + $0xc] sm:$0x7] (!%p248_p3)  ;;  %v1361_v33 = vld [vmem:[%s1739_s3 + $0x1c] sm:$0x7] (!%p248_p3)  ;;  %v1365_v40 = vld [vmem:[%s1739_s3 + $0x20] sm:$0x7] (!%p248_p3) }
   0xe   : > { %v1369_v51 = vld [vmem:[%s1740_s4] ss:$0 sm:$0xff] (!%p248_p3) }
  0x10   : > { %s1754_s19 = smov (!%p303_p5, %s1534_s19), 1  ;;  %s1756_s29 = smov (!%p315_p7, %s312_s29), 17 }
  0x11   : > { %s306_s9 = scalar_select %p305_p6, %s1530_s18, 17 }
  0x12   : > { %s1634_s10 = smul.u32 54, %s1754_s19  ;;  %s1758_s12 = smov (!%p1641_p8, %s323_s12), 17 }
  0x13   : > { %s1464_s11 = smul.u32 3, %s306_s9  ;;  %s1760_s18 = smov (!%p336_p9, %s1530_s18), 15 }
  0x14   : > { %s1466_s15 = smul.u32 3, %s1756_s29  ;;  %s1331_s30 = sshll.u32 %s1760_s18, 1 }
  0x15   : > { %s309_s13 = sadd.s32 %s1634_s10, %s1464_s11  ;;  %s1467_s9 = smul.u32 3, %s1758_s12 }
  0x16   : > { %s1328_s14 = sshll.u32 %s309_s13, 3  ;;  %s319_s27 = sadd.s32 %s1466_s15, %s1634_s10 }
  0x17   : > { %s311_s25 = scalar_lea.vmem %s1736_s0, %s1328_s14  ;;  %s1329_s28 = sshll.u32 %s319_s27, 3 }
  0x18   : > { %v343_v4 = vld [vmem:[%s311_s25] sm:$0xff]  ;;  %v344_v5 = vld [vmem:[%s311_s25 + $0x8] sm:$0xff]  ;;  %v345_v6 = vld [vmem:[%s311_s25 + $0x10] sm:$0x3]  ;;  %s321_s6 = scalar_lea.vmem %s1737_s1, %s1329_s28  ;;  %s330_s12 = sadd.s32 %s1467_s9, %s1634_s10 }
  0x19   : > { %v359_v7 = vrot.slane %v343_v4, 1  ;;  %v360_v8 = vrot.slane %v344_v5, 1  ;;  %v362_v9 = vrot.slane %v345_v6, 1  ;;  %v346_v12 = vld [vmem:[%s321_s6] sm:$0xff]  ;;  %v347_v13 = vld [vmem:[%s321_s6 + $0x8] sm:$0xff]  ;;  %v533_v25 = vrot.slane %v343_v4, 2 }
  0x1a   : > { %v348_v14 = vld [vmem:[%s321_s6 + $0x10] sm:$0x3]  ;;  %v713_v15 = vrot.slane %v346_v12, 1  ;;  %v714_v16 = vrot.slane %v347_v13, 1  ;;  %v804_v19 = vrot.slane %v346_v12, 2  ;;  %v805_v20 = vrot.slane %v347_v13, 2 }
  0x1b   : > { %v361_v10 = vsel %vm358_vm1, %v359_v7, %v360_v8  ;;  %v363_v11 = vsel %vm358_vm1, %v360_v8, %v362_v9  ;;  %v716_v17 = vrot.slane %v348_v14, 1  ;;  %v534_v26 = vrot.slane %v344_v5, 2  ;;  %s1330_s14 = sshll.u32 %s330_s12, 3  ;;  %s1332_s6 = sshll.u32 %s1754_s19, 5 }
  0x1c   : > { %1405 = vmatprep.mubr.msk.f32.mxu1 %vm364_vm2, %v361_v10  ;;  %v715_v21 = vsel %vm358_vm1, %v713_v15, %v714_v16  ;;  %v806_v23 = vsel %vm532_vm3, %v804_v19, %v805_v20  ;;  %v807_v27 = vrot.slane %v348_v14, 2  ;;  %s332_s17 = scalar_lea.vmem %s1738_s2, %s1330_s14  ;;  %v536_v31 = vrot.slane %v345_v6, 2  ;;  %s340_s7 = sadd.s32 %s1332_s6, %s1331_s30 }
  0x1d   : > { %1406 = vmatmul.mubr.msk.f32.vlgmr.msra.gmra.mrb[0].mxu1 %vm364_vm2, %v363_v11  ;;  %v717_v22 = vsel %vm358_vm1, %v714_v16, %v716_v17  ;;  %1425 = vmatprep.mubr.msk.f32.mxu0 %vm364_vm2, %v715_v21  ;;  %v535_v28 = vsel %vm532_vm3, %v533_v25, %v534_v26  ;;  %v349_v32 = vld [vmem:[%s332_s17] sm:$0xff]  ;;  %v350_v34 = vld [vmem:[%s332_s17 + $0x8] sm:$0xff]  ;;  %v351_v38 = vld [vmem:[%s332_s17 + $0x10] sm:$0x3]  ;;  %s1333_s11 = sshll.u32 %s340_s7, 2 }
  0x1e   : > { %1409 = vmatpush3.msk.msra.mxu1 %vm369_vm0, %v352_v3  ;;  %1410 = vmatprep.mubr.msk.f32.mxu1 %vm364_vm2, %v343_v4  ;;  %v808_v30 = vsel %vm532_vm3, %v805_v20, %v807_v27  ;;  %v537_v35 = vsel %vm532_vm3, %v534_v26, %v536_v31  ;;  %v984_v36 = vrot.slane %v349_v32, 1  ;;  %v985_v37 = vrot.slane %v350_v34, 1  ;;  %s342_s14 = scalar_lea.vmem %s1741_s5, %s1333_s11 }
  0x1f   : > { %1413 = vmatprep.subr.msk.mxu1 %vm369_vm0, %v1341_v18  ;;  %1426 = vmatmul.mubr.msk.f32.vlgmr.msra.gmra.mrb[0].mxu0 %vm364_vm2, %v717_v22  ;;  %v987_v41 = vrot.slane %v351_v38, 1  ;;  %v1075_v42 = vrot.slane %v349_v32, 2  ;;  %v1076_v43 = vrot.slane %v350_v34, 2  ;;  %v1078_v46 = vrot.slane %v351_v38, 2 }
  0x20   : > { %1429 = vmatpush3.msk.msra.mxu0 %vm369_vm0, %v1353_v2  ;;  %1430 = vmatprep.mubr.msk.f32.mxu0 %vm364_vm2, %v806_v23  ;;  %v986_v39 = vsel %vm358_vm1, %v984_v36, %v985_v37 }
  0x21   : > { %1433 = vmatprep.subr.msk.mxu0 %vm369_vm0, %v1357_v24  ;;  %v988_v44 = vsel %vm358_vm1, %v985_v37, %v987_v41  ;;  %v1077_v45 = vsel %vm532_vm3, %v1075_v42, %v1076_v43  ;;  %v1079_v47 = vsel %vm532_vm3, %v1076_v43, %v1078_v46 }
  0x25   : > { %1411 = vmatmul.mubr.msk.f32.vlgmr.msra.gmra.mrb[0].mxu1 %vm364_vm2, %v344_v5 }
  0x26   : > { %1414 = vmatpush3.msk.msra.mxu1 %vm369_vm0, %v1341_v18  ;;  %1415 = vmatprep.mubr.msk.f32.mxu1 %vm364_vm2, %v535_v28 }
  0x27   : > { %1418 = vmatprep.subr.msk.mxu1 %vm369_vm0, %v1345_v29  ;;  %1431 = vmatmul.mubr.msk.f32.vlgmr.msra.gmra.mrb[0].mxu0 %vm364_vm2, %v808_v30 }
  0x28   : > { %1434 = vmatpush3.msk.msra.mxu0 %vm369_vm0, %v1357_v24  ;;  %1435 = vmatprep.mubr.msk.f32.mxu0 %vm364_vm2, %v349_v32 }
  0x29   : > { %1438 = vmatprep.subr.msk.mxu0 %vm369_vm0, %v1361_v33 }
  0x2d   : > { %1416 = vmatmul.mubr.msk.f32.vlgmr.msra.gmra.mrb[0].mxu1 %vm364_vm2, %v537_v35 }
  0x2e   : > { %1419 = vmatpush3.msk.msra.mxu1 %vm369_vm0, %v1345_v29  ;;  %1420 = vmatprep.mubr.msk.f32.mxu1 %vm364_vm2, %v346_v12 }
  0x2f   : > { %1436 = vmatmul.mubr.msk.f32.vlgmr.msra.gmra.mrb[0].mxu0 %vm364_vm2, %v350_v34 }
  0x30   : > { %1439 = vmatpush3.msk.msra.mxu0 %vm369_vm0, %v1361_v33  ;;  %1440 = vmatprep.mubr.msk.f32.mxu0 %vm364_vm2, %v986_v39 }
  0x31   : > { %1443 = vmatprep.subr.msk.mxu0 %vm369_vm0, %v1365_v40 }
  0x35   : > { %1421 = vmatmul.mubr.msk.f32.vlgmr.msra.gmra.mrb[0].mxu1 %vm364_vm2, %v347_v13 }
  0x37   : > { %1441 = vmatmul.mubr.msk.f32.vlgmr.msra.gmra.mrb[0].mxu0 %vm364_vm2, %v988_v44 }
  0x38   : > { %1444 = vmatpush3.msk.msra.mxu0 %vm369_vm0, %v1365_v40  ;;  %1445 = vmatprep.mubr.msk.f32.mxu0 %vm364_vm2, %v1077_v45 }
  0x3f   : > { %1446 = vmatmul.mubr.msk.f32.vlgmr.msra.gmra.mrb[0].mxu0 %vm364_vm2, %v1079_v47 }
 0x108   : > { %v1422_v48 = vpop.f32.mrb[0].mxu1 }
 0x109   : > { %v699_v49 = vpop.f32.mrb[1].mxu1 }
 0x112   : > { %v1447_v50 = vpop.f32.mrb[0].mxu0 }
 0x113   : > { %v1448_v52 = vadd.f32 %v1447_v50, %v1422_v48  ;;  %v1153_v53 = vpop.f32.mrb[1].mxu0 }
 0x114   : > { %v1449_v54 = vadd.f32 %v1153_v53, %v699_v49 }
 0x115   : > { %v1172_v55 = vadd.f32 %v1448_v52, %v1369_v51 }
 0x116   : > { %v1171_v56 = vadd.f32 %v1449_v54, %v1369_v51 }
 0x117   : > { %v1174_v57 = vmax.f32 %v1172_v55, 0.0 }
 0x118   : > { %v1173_v58 = vmax.f32 %v1171_v56, 0.0 }
 0x119   : > { %v1375_v59 = vpack.c.bf16 %v1174_v57, %v1174_v57 }
 0x11a   : > { %v1374_v60 = vpack.c.bf16 %v1173_v58, %v1173_v58 }
 0x11b   : > { %1185 = vst.msk [vmem:[%s342_s14 + $0x4] sm:$0xf] %vm1183_vm4, %v1375_v59 }
 0x11c   : > { %1184 = vst.msk [vmem:[%s342_s14] sm:$0xf] %vm1183_vm4, %v1374_v60 }
 0x11d PF: > { %s15_s22 = sadd.s32 1, %s1546_s22   ;;  %s1743_s18 = smov %s1538_s20 }
 0x11e   : > { %p12_p10 = scmp.ge.s32.totalorder %s15_s22, 34   ;;  %s1744_s19 = smov %s1542_s21 }
 0x11f   : > { %s1745_s20 = smov %s1748_s23  ;;  %s1746_s21 = smov %s1752_s24 }
 0x120   :  { %14 = sbr.rel (!%p12_p10) target bundleno = 3 (0x3), region = 84 }

// kernel: meta_proposal_network_forward.4
= control target key start
LH: loop header
LB: loop body
LE: loop exit
PB: predicated region body
PF: predicated region fallthrough
CT: control target
= control target key end

     0   :  { %s1467_s18 = smov 0   ;;  %s1469_s19 = smov 0   ;;  %s1653_s0 = inlined_call_operand.vmem [shape: bf16[2,18,18,32], index: 0, kind: input, shape index: {}, may-alias: {0,1,2}]   ;;  %s1654_s1 = inlined_call_operand.vmem [shape: bf16[2,18,18,32], index: 1, kind: input, shape index: {}, may-alias: {0,1,2}]   ;;  %s1655_s2 = inlined_call_operand.vmem [shape: bf16[2,18,18,32], index: 2, kind: input, shape index: {}, may-alias: {0,1,2}]   ;;  %s1656_s3 = inlined_call_operand.vmem [shape: bf16[3,3,32,64], index: 3, kind: input, shape index: {}]   ;;  %s1657_s4 = inlined_call_operand.vmem [shape: f32[1,64], index: 4, kind: input, shape index: {}]   ;;  %s1658_s5 = inlined_call_operand.vmem [shape: bf16[2,16,16,64], index: 5, kind: output, shape index: {}]  }
   0x1   :  { %s1471_s20 = smov 0   ;;  %s1473_s21 = smov 0  }
   0x2   :  { %s1475_s22 = smov 0  }
   0x3 LB: > { %s24_s23 = sadd.s32 1, %s1425_s20  ;;  %s27_s24 = sadd.s32 1, %s1429_s21  ;;  %s1433_s22 = sphi %s1475_s22, %s15_s22   ;;  %s1429_s21 = sphi %s1473_s21, %s1662_s21   ;;  %s1425_s20 = sphi %s1471_s20, %s1661_s20   ;;  %s1421_s19 = sphi %s1469_s19, %s1660_s19   ;;  %s1417_s18 = sphi %s1467_s18, %s1659_s18  }
   0x4   : > { %p25_p0 = scmp.ge.s32.totalorder %s24_s23, 16  ;;  %p1147_p1 = scmp.ge.s32.totalorder %s1433_s22, 1 }
   0x5   : > { %p247_p2 = scmp.lt.s32.totalorder %s1433_s22, 33 }
   0x6   : > { %s1664_s23 = smov (%p25_p0, %s24_s23), 0  ;;  %s1666_s24 = smov (!%p25_p0, %s27_s24), %s1429_s21 }
   0x7   : > { %p248_p3 = pnand %p1147_p1, %p247_p2  ;;  %p29_p4 = scmp.ge.s32.totalorder %s1666_s24, 2 }
   0x8   : > { %v1371_v0 = vld [vmem:[%s1656_s3 + $0x10] sm:$0xff] (!%p248_p3)   ;;  %v1435_v1 = vmov (!%p248_p3), 0.0   ;;  %v1372_v2 = vld [vmem:[%s1656_s3] sm:$0xff] (!%p248_p3)   ;;  %v1373_v3 = vld [vmem:[%s1656_s3 + $0x18] sm:$0xff] (!%p248_p3)   ;;  %vm1436_vm0 = vmmov (!%p248_p3), 0   ;;  %p303_p5 = scmp.lt.s32.totalorder (!%p248_p3), %s1421_s19, 1 }
   0x9   : > { %s1668_s24 = smov (%p29_p4, %s1666_s24), 0  ;;  %251 = sbr.rel (%p248_p3) target bundleno = 287 (0x11f), region = 40 }
   0xa   : > { %1253 = vmatprep.subr.bf16.mxu0 (!%p248_p3), %v1435_v1  ;;  %1261 = vmatprep.subr.bf16.mxu1 (!%p248_p3), %v1435_v1  ;;  %v1374_v4 = vld [vmem:[%s1656_s3 + $0x8] sm:$0xff] (!%p248_p3)   ;;  %p305_p6 = scmp.lt.s32.totalorder (!%p248_p3), %s1417_s18, 17  ;;  %s312_s12 = sadd.s32 (!%p248_p3), 1, %s1417_s18  ;;  %vm395_vm1 = vcmask (!%p248_p3), 261120   ;;  %v1378_v5 = vld [vmem:[%s1656_s3 + $0x30] sm:$0xff] (!%p248_p3)   ;;  %v1380_v11 = vld [vmem:[%s1656_s3 + $0x38] sm:$0xff] (!%p248_p3)  }
   0xb   : > { %1254 = vmatpush3.bf16.msra.mxu0 (!%p248_p3), %v1371_v0  ;;  %1257 = vmatprep.mubr.msk.bf16.mxu0 (!%p248_p3), %vm1436_vm0, %v1435_v1  ;;  %p315_p7 = scmp.lt.s32.totalorder (!%p248_p3), %s312_s12, 17  ;;  %vm370_vm2 = vsmask.f32 (!%p248_p3), 7424  ;;  %v1377_v15 = vld [vmem:[%s1656_s3 + $0x20] sm:$0xff] (!%p248_p3)   ;;  %v1383_v18 = vld [vmem:[%s1656_s3 + $0x50] sm:$0xff] (!%p248_p3)   ;;  %v1379_v19 = vld [vmem:[%s1656_s3 + $0x28] sm:$0xff] (!%p248_p3)  }
   0xc   : > { %1262 = vmatpush3.bf16.msra.mxu1 (!%p248_p3), %v1372_v2  ;;  %1255 = vmatprep.subr.bf16.mxu0 (!%p248_p3), %v1435_v1  ;;  %vm500_vm3 = vcmask (!%p248_p3), 1046528   ;;  %v1385_v24 = vld [vmem:[%s1656_s3 + $0x58] sm:$0xff] (!%p248_p3)   ;;  %v1381_v28 = vld [vmem:[%s1656_s3 + $0x40] sm:$0xff] (!%p248_p3)   ;;  %v1388_v32 = vld [vmem:[%s1656_s3 + $0x70] sm:$0xff] (!%p248_p3)   ;;  %p336_p9 = scmp.lt.s32.totalorder (!%p248_p3), %s1417_s18, 15  ;;  %vm1003_vm4 = vcmask (!%p248_p3), 519168  }
   0xd   : > { %1263 = vmatprep.subr.bf16.mxu1 (!%p248_p3), %v1435_v1  ;;  %1265 = vmatprep.mubr.msk.bf16.mxu1 (!%p248_p3), %vm1436_vm0, %v1435_v1  ;;  %v1384_v36 = vld [vmem:[%s1656_s3 + $0x48] sm:$0xff] (!%p248_p3)   ;;  %v1390_v42 = vld [vmem:[%s1656_s3 + $0x78] sm:$0xff] (!%p248_p3)   ;;  %v1387_v46 = vld [vmem:[%s1656_s3 + $0x60] sm:$0xff] (!%p248_p3)  }
   0xe   : > { %v1389_v49 = vld [vmem:[%s1656_s3 + $0x68] sm:$0xff] (!%p248_p3)   ;;  %v1392_v50 = vld [vmem:[%s1656_s3 + $0x80] sm:$0xff] (!%p248_p3)  }
   0xf   : > { %1256 = vmatpush3.bf16.msra.mxu0 (!%p248_p3), %v1373_v3  ;;  %v1394_v51 = vld [vmem:[%s1656_s3 + $0x88] sm:$0xff] (!%p248_p3)  }
  0x10   : > { %s1670_s19 = smov (!%p303_p5, %s1421_s19), 1  ;;  %1264 = vmatpush3.bf16.msra.mxu1 %v1374_v4  ;;  %1269 = vmatprep.subr.bf16.mxu0 %v1435_v1  ;;  %s1672_s12 = smov (!%p315_p7, %s312_s12), 17 }
  0x11   : > { %s306_s8 = scalar_select %p305_p6, %s1417_s18, 17  ;;  %1277 = vmatprep.subr.bf16.mxu1 %v1435_v1 }
  0x12   : > { %s1528_s9 = smul.u32 54, %s1670_s19  ;;  %s1152_s6 = sshll.u32 %s1670_s19, 5 }
  0x13   : > { %s1325_s10 = smul.u32 3, %s306_s8 }
  0x14   : > { %s1327_s26 = smul.u32 3, %s1672_s12  ;;  %s323_s12 = sadd.s32 2, %s1417_s18 }
  0x15   : > { %s309_s11 = sadd.s32 %s1528_s9, %s1325_s10  ;;  %p326_p8 = scmp.lt.s32.totalorder %s323_s12, 17 }
  0x16   : > { %s1148_s13 = sshll.u32 %s309_s11, 2  ;;  %s319_s29 = sadd.s32 %s1327_s26, %s1528_s9 }
  0x17   : > { %s311_s25 = scalar_lea.vmem %s1653_s0, %s1148_s13  ;;  %s1149_s30 = sshll.u32 %s319_s29, 2 }
  0x18   : > { %v1375_v6 = vld [vmem:[%s311_s25] sm:$0xff]   ;;  %v1376_v7 = vld [vmem:[%s311_s25 + $0x8] ss:$0 sps:$4 sm:$0x11]   ;;  %s321_s11 = scalar_lea.vmem %s1654_s1, %s1149_s30  ;;  %s1674_s12 = smov (!%p326_p8, %s323_s12), 17 }
  0x19   : > { %v372_v8 = vshrl.u32 %v1375_v6, 16  ;;  %v374_v9 = vshll.u32 %v1375_v6, 16  ;;  %v379_v10 = vshll.u32 %v1376_v7, 16  ;;  %1266 = vmatmul.mubr.msk.bf16.vlgmr.msra.gmra.mrb[0].mxu1 %vm395_vm1, %v1375_v6  ;;  %v1382_v16 = vld [vmem:[%s321_s11] sm:$0xff]   ;;  %v501_v20 = vrot.slane %v1375_v6, 1  ;;  %s1328_s17 = smul.u32 3, %s1674_s12 }
  0x1a   : > { %1278 = vmatpush3.bf16.msra.mxu1 %v1378_v5  ;;  %1281 = vmatprep.mubr.msk.bf16.mxu1 %vm1436_vm0, %v1435_v1  ;;  %v502_v21 = vrot.slane %v1376_v7, 1  ;;  %v1386_v22 = vld [vmem:[%s321_s11 + $0x8] ss:$0 sps:$4 sm:$0x11]   ;;  %v640_v23 = vshll.u32 %v1382_v16, 16  ;;  %v712_v25 = vrot.slane %v1382_v16, 1 }
  0x1b   : > { %v376_v12 = vrot.slane %v374_v9, 1  ;;  %v381_v13 = vrot.slane %v379_v10, 1  ;;  %1279 = vmatprep.subr.bf16.mxu1 %v1435_v1  ;;  %v713_v26 = vrot.slane %v1386_v22, 1  ;;  %s330_s27 = sadd.s32 %s1328_s17, %s1528_s9  ;;  %v638_v29 = vshrl.u32 %v1382_v16, 16  ;;  %s1676_s18 = smov (!%p336_p9, %s1417_s18), 15 }
  0x1c   : > { %v503_v27 = vsel %vm500_vm3, %v501_v20, %v502_v21  ;;  %v642_v30 = vrot.slane %v640_v23, 1  ;;  %v645_v31 = vshll.u32 %v1386_v22, 16  ;;  %s1150_s30 = sshll.u32 %s330_s27, 2 }
  0x1d   : > { %v377_v14 = vor.u32 %v376_v12, %v372_v8  ;;  %s332_s9 = scalar_lea.vmem %s1655_s2, %s1150_s30  ;;  %v714_v33 = vsel %vm500_vm3, %v712_v25, %v713_v26  ;;  %s1151_s30 = sshll.u32 %s1676_s18, 1 }
  0x1e   : > { %1280 = vmatpush3.bf16.msra.mxu1 %v1380_v11  ;;  %v1391_v34 = vld [vmem:[%s332_s9] sm:$0xff]   ;;  %v1393_v35 = vld [vmem:[%s332_s9 + $0x8] ss:$0 sps:$4 sm:$0x11]   ;;  %v643_v37 = vor.u32 %v642_v30, %v638_v29  ;;  %v647_v38 = vrot.slane %v645_v31, 1  ;;  %s340_s7 = sadd.s32 %s1152_s6, %s1151_s30 }
  0x1f   : > { %v382_v17 = vsel %vm370_vm2, %v377_v14, %v381_v13  ;;  %1293 = vmatprep.subr.bf16.mxu1 %v1435_v1  ;;  %v849_v39 = vshrl.u32 %v1391_v34, 16  ;;  %v851_v40 = vshll.u32 %v1391_v34, 16  ;;  %v856_v41 = vshll.u32 %v1393_v35, 16  ;;  %s1153_s9 = sshll.u32 %s340_s7, 2 }
  0x20   : > { %1258 = vmatmul.mubr.msk.bf16.vlgmr.msra.gmra.mrb[0].mxu0 %vm395_vm1, %v382_v17  ;;  %v648_v45 = vsel %vm370_vm2, %v643_v37, %v647_v38  ;;  %v923_v52 = vrot.slane %v1391_v34, 1  ;;  %v924_v53 = vrot.slane %v1393_v35, 1  ;;  %v1219_v38 = vld [vmem:[%s1657_s4] ss:$0 sm:$0xff]  ;;  %s342_s18 = scalar_lea.vmem %s1658_s5, %s1153_s9 }
  0x21   : > { %1270 = vmatpush3.bf16.msra.mxu0 %v1377_v15  ;;  %1273 = vmatprep.mubr.msk.bf16.mxu0 %vm1436_vm0, %v1435_v1  ;;  %v853_v43 = vrot.slane %v851_v40, 1  ;;  %v858_v44 = vrot.slane %v856_v41, 1 }
  0x22   : > { %1271 = vmatprep.subr.bf16.mxu0 %v1435_v1  ;;  %1282 = vmatmul.mubr.msk.bf16.vlgmr.msra.gmra.mrb[4].mxu1 %vm395_vm1, %v1382_v16  ;;  %v925_v54 = vsel %vm500_vm3, %v923_v52, %v924_v53 }
  0x23   : > { %1294 = vmatpush3.bf16.msra.mxu1 %v1383_v18  ;;  %1297 = vmatprep.mubr.msk.bf16.mxu1 %vm1436_vm0, %v1435_v1  ;;  %v854_v47 = vor.u32 %v853_v43, %v849_v39 }
  0x24   : > { %1295 = vmatprep.subr.bf16.mxu1 %v1435_v1 }
  0x25   : > { %1272 = vmatpush3.bf16.msra.mxu0 %v1379_v19  ;;  %v859_v48 = vsel %vm370_vm2, %v854_v47, %v858_v44 }
  0x26   : > { %1285 = vmatprep.subr.bf16.mxu0 %v1435_v1 }
  0x27   : > { %1296 = vmatpush3.bf16.msra.mxu1 %v1385_v24 }
  0x28   : > { %1274 = vmatmul.mubr.msk.bf16.vlgmr.msra.gmra.mrb[4].mxu0 %vm395_vm1, %v503_v27  ;;  %1309 = vmatprep.subr.bf16.mxu1 %v1435_v1 }
  0x29   : > { %1286 = vmatpush3.bf16.msra.mxu0 %v1381_v28  ;;  %1289 = vmatprep.mubr.msk.bf16.mxu0 %vm1436_vm0, %v1435_v1 }
  0x2a   : > { %1287 = vmatprep.subr.bf16.mxu0 %v1435_v1  ;;  %1298 = vmatmul.mubr.msk.bf16.vlgmr.msra.gmra.mrb[8].mxu1 %vm395_vm1, %v714_v33 }
  0x2b   : > { %1310 = vmatpush3.bf16.msra.mxu1 %v1388_v32  ;;  %1313 = vmatprep.mubr.msk.bf16.mxu1 %vm1436_vm0, %v1435_v1 }
  0x2c   : > { %1311 = vmatprep.subr.bf16.mxu1 %v1435_v1 }
  0x2d   : > { %1288 = vmatpush3.bf16.msra.mxu0 %v1384_v36 }
  0x2e   : > { %1301 = vmatprep.subr.bf16.mxu0 %v1435_v1 }
  0x2f   : > { %1312 = vmatpush3.bf16.msra.mxu1 %v1390_v42 }
  0x30   : > { %1290 = vmatmul.mubr.msk.bf16.vlgmr.msra.gmra.mrb[8].mxu0 %vm395_vm1, %v648_v45 }
  0x31   : > { %1302 = vmatpush3.bf16.msra.mxu0 %v1387_v46  ;;  %1305 = vmatprep.mubr.msk.bf16.mxu0 %vm1436_vm0, %v1435_v1 }
  0x32   : > { %1303 = vmatprep.subr.bf16.mxu0 %v1435_v1  ;;  %1314 = vmatmul.mubr.msk.bf16.vlgmr.msra.gmra.mrb[12].mxu1 %vm395_vm1, %v859_v48 }
  0x35   : > { %1304 = vmatpush3.bf16.msra.mxu0 %v1389_v49 }
  0x36   : > { %1317 = vmatprep.subr.bf16.mxu0 %v1435_v1 }
  0x38   : > { %1306 = vmatmul.mubr.msk.bf16.vlgmr.msra.gmra.mrb[12].mxu0 %vm395_vm1, %v1391_v34 }
  0x39   : > { %1318 = vmatpush3.bf16.msra.mxu0 %v1392_v50  ;;  %1321 = vmatprep.mubr.msk.bf16.mxu0 %vm1436_vm0, %v1435_v1 }
  0x3a   : > { %1319 = vmatprep.subr.bf16.mxu0 %v1435_v1 }
  0x3d   : > { %1320 = vmatpush3.bf16.msra.mxu0 %v1394_v51 }
  0x40   : > { %1322 = vmatmul.mubr.msk.bf16.vlgmr.msra.gmra.mrb[16].mxu0 %vm395_vm1, %v925_v54 }
  0xec   : > { %v488_v55 = vpop.f32.mrb[0].mxu1 }
  0xed   : > { %v1267_v56 = vpop.f32.mrb[1].mxu1 }
  0xee   : > { %v491_v57 = vpop.f32.mrb[2].mxu1 }
  0xef   : > { %v1268_v58 = vpop.f32.mrb[3].mxu1 }
  0xf3   : > { %v433_v59 = vpop.f32.mrb[0].mxu0 }
  0xf4   : > { %v489_v60 = vadd.f32 %v488_v55, %v433_v59  ;;  %v1259_v61 = vpop.f32.mrb[1].mxu0 }
  0xf5   : > { %v436_v62 = vpop.f32.mrb[2].mxu0  ;;  %v621_v63 = vpop.f32.mrb[4].mxu1 }
  0xf6   : > { %v492_v0 = vadd.f32 %v491_v57, %v436_v62  ;;  %v1260_v2 = vpop.f32.mrb[3].mxu0  ;;  %v1283_v3 = vpop.f32.mrb[5].mxu1 }
  0xf7   : > { %v624_v4 = vpop.f32.mrb[6].mxu1 }
  0xf8   : > { %v1284_v5 = vpop.f32.mrb[7].mxu1 }
  0xfb   : > { %v553_v1 = vpop.f32.mrb[4].mxu0 }
  0xfc   : > { %v560_v6 = vadd.f32 %v553_v1, %v489_v60  ;;  %v1275_v7 = vpop.f32.mrb[5].mxu0 }
  0xfd   : > { %v556_v8 = vpop.f32.mrb[6].mxu0  ;;  %v764_v9 = vpop.f32.mrb[8].mxu1 }
  0xfe   : > { %v561_v10 = vadd.f32 %v556_v8, %v492_v0  ;;  %v628_v11 = vadd.f32 %v621_v63, %v560_v6  ;;  %v1276_v12 = vpop.f32.mrb[7].mxu0  ;;  %v1299_v13 = vpop.f32.mrb[9].mxu1 }
  0xff   : > { %v767_v14 = vpop.f32.mrb[10].mxu1 }
 0x100   : > { %v629_v15 = vadd.f32 %v624_v4, %v561_v10  ;;  %v1300_v16 = vpop.f32.mrb[11].mxu1 }
 0x103   : > { %v698_v17 = vpop.f32.mrb[8].mxu0 }
 0x104   : > { %v705_v18 = vadd.f32 %v698_v17, %v628_v11  ;;  %v1291_v19 = vpop.f32.mrb[9].mxu0 }
 0x105   : > { %v701_v20 = vpop.f32.mrb[10].mxu0  ;;  %v909_v21 = vpop.f32.mrb[12].mxu1 }
 0x106   : > { %v706_v22 = vadd.f32 %v701_v20, %v629_v15  ;;  %v771_v23 = vadd.f32 %v764_v9, %v705_v18  ;;  %v1292_v24 = vpop.f32.mrb[11].mxu0  ;;  %v1315_v25 = vpop.f32.mrb[13].mxu1 }
 0x107   : > { %v912_v26 = vpop.f32.mrb[14].mxu1 }
 0x108   : > { %v772_v27 = vadd.f32 %v767_v14, %v706_v22  ;;  %v1316_v28 = vpop.f32.mrb[15].mxu1 }
 0x10b   : > { %v832_v29 = vpop.f32.mrb[12].mxu0 }
 0x10c   : > { %v839_v30 = vadd.f32 %v832_v29, %v771_v23  ;;  %v1307_v31 = vpop.f32.mrb[13].mxu0 }
 0x10d   : > { %v835_v32 = vpop.f32.mrb[14].mxu0 }
 0x10e   : > { %v840_v33 = vadd.f32 %v835_v32, %v772_v27  ;;  %v916_v34 = vadd.f32 %v909_v21, %v839_v30  ;;  %v1308_v35 = vpop.f32.mrb[15].mxu0 }
 0x110   : > { %v917_v36 = vadd.f32 %v912_v26, %v840_v33 }
 0x113   : > { %v975_v37 = vpop.f32.mrb[16].mxu0 }
 0x114   : > { %v982_v39 = vadd.f32 %v975_v37, %v916_v34  ;;  %v1323_v40 = vpop.f32.mrb[17].mxu0 }
 0x115   : > { %v978_v41 = vpop.f32.mrb[18].mxu0 }
 0x116   : > { %v991_v42 = vadd.f32 %v1219_v38, %v982_v39  ;;  %v983_v43 = vadd.f32 %v978_v41, %v917_v36  ;;  %v1324_v44 = vpop.f32.mrb[19].mxu0 }
 0x118   : > { %v993_v45 = vmax.f32 %v991_v42, 0.0  ;;  %v992_v46 = vadd.f32 %v1219_v38, %v983_v43 }
 0x11a   : > { %v1224_v47 = vpack.c.bf16 %v993_v45, %v993_v45  ;;  %v994_v48 = vmax.f32 %v992_v46, 0.0 }
 0x11c   : > { %1004 = vst.msk [vmem:[%s342_s18] sm:$0xf] %vm1003_vm4, %v1224_v47  ;;  %v1225_v49 = vpack.c.bf16 %v994_v48, %v994_v48 }
 0x11e   : > { %1005 = vst.msk [vmem:[%s342_s18 + $0x4] sm:$0xf] %vm1003_vm4, %v1225_v49 }
 0x11f PF: > { %s15_s22 = sadd.s32 1, %s1433_s22   ;;  %s1659_s18 = smov %s1425_s20 }
 0x120   : > { %p12_p10 = scmp.ge.s32.totalorder %s15_s22, 34   ;;  %s1660_s19 = smov %s1429_s21 }
 0x121   : > { %s1661_s20 = smov %s1664_s23  ;;  %s1662_s21 = smov %s1668_s24 }
 0x122   :  { %14 = sbr.rel (!%p12_p10) target bundleno = 3 (0x3), region = 84 }

// kernel: meta_proposal_network_forward.5
= control target key start
LH: loop header
LB: loop body
LE: loop exit
PB: predicated region body
PF: predicated region fallthrough
CT: control target
= control target key end

     0   :  { %s1719_s18 = smov 0   ;;  %s1721_s19 = smov 0   ;;  %s1985_s0 = inlined_call_operand.vmem [shape: bf16[2,18,18,64], index: 0, kind: input, shape index: {}, may-alias: {0,1,2}]   ;;  %s1986_s1 = inlined_call_operand.vmem [shape: bf16[2,18,18,64], index: 1, kind: input, shape index: {}, may-alias: {0,1,2}]   ;;  %s1987_s2 = inlined_call_operand.vmem [shape: bf16[2,18,18,64], index: 2, kind: input, shape index: {}, may-alias: {0,1,2}]   ;;  %s1988_s3 = inlined_call_operand.vmem [shape: bf16[3,3,64,9], index: 3, kind: input, shape index: {}]   ;;  %s1989_s4 = inlined_call_operand.vmem [shape: f32[1,9], index: 4, kind: input, shape index: {}]   ;;  %s1990_s5 = inlined_call_operand.vmem [shape: f32[2,16,16,9], index: 5, kind: output, shape index: {}]  }
   0x1   :  { %s1723_s20 = smov 0   ;;  %s1725_s21 = smov 0  }
   0x2   :  { %s1727_s22 = smov 0  }
   0x3 LB: > { %s24_s23 = sadd.s32 1, %s1677_s20  ;;  %s27_s24 = sadd.s32 1, %s1681_s21  ;;  %s1685_s22 = sphi %s1727_s22, %s15_s22   ;;  %s1681_s21 = sphi %s1725_s21, %s1994_s21   ;;  %s1677_s20 = sphi %s1723_s20, %s1993_s20   ;;  %s1673_s19 = sphi %s1721_s19, %s1992_s19   ;;  %s1669_s18 = sphi %s1719_s18, %s1991_s18  }
   0x4   : > { %p25_p0 = scmp.ge.s32.totalorder %s24_s23, 16  ;;  %p1281_p1 = scmp.ge.s32.totalorder %s1685_s22, 1 }
   0x5   : > { %p247_p2 = scmp.lt.s32.totalorder %s1685_s22, 33 }
   0x6   : > { %s1996_s23 = smov (%p25_p0, %s24_s23), 0  ;;  %s1998_s24 = smov (!%p25_p0, %s27_s24), %s1681_s21 }
   0x7   : > { %p248_p3 = pnand %p1281_p1, %p247_p2  ;;  %p29_p4 = scmp.ge.s32.totalorder %s1998_s24, 2 }
   0x8   : > { %v1605_v0 = vld [vmem:[%s1988_s3 + $0x20] sm:$0xff] (!%p248_p3)   ;;  %v1687_v1 = vmov (!%p248_p3), 0.0   ;;  %v1607_v3 = vld [vmem:[%s1988_s3 + $0x28] sm:$0xff] (!%p248_p3)   ;;  %vm1688_vm0 = vmmov (!%p248_p3), 0   ;;  %p303_p5 = scmp.lt.s32.totalorder (!%p248_p3), %s1673_s19, 1  ;;  %p305_p6 = scmp.lt.s32.totalorder (!%p248_p3), %s1669_s18, 17 }
   0x9   : > { %s2000_s24 = smov (%p29_p4, %s1998_s24), 0  ;;  %251 = sbr.rel (%p248_p3) target bundleno = 315 (0x13b), region = 40 }
   0xa   : > { %1451 = vmatprep.subr.bf16.mxu0 (!%p248_p3), %v1687_v1  ;;  %1463 = vmatprep.subr.bf16.mxu1 (!%p248_p3), %v1687_v1  ;;  %v1606_v2 = vld [vmem:[%s1988_s3] sm:$0xff] (!%p248_p3)   ;;  %v1608_v4 = vld [vmem:[%s1988_s3 + $0x8] sm:$0xff] (!%p248_p3)   ;;  %v1609_v5 = vld [vmem:[%s1988_s3 + $0x30] sm:$0xff] (!%p248_p3)   ;;  %s312_s6 = sadd.s32 (!%p248_p3), 1, %s1669_s18  ;;  %vm415_vm1 = vcmask (!%p248_p3), 523264   ;;  %s323_s17 = sadd.s32 (!%p248_p3), 2, %s1669_s18 }
   0xb   : > { %1452 = vmatpush3.bf16.msra.mxu0 (!%p248_p3), %v1605_v0  ;;  %1459 = vmatprep.mubr.msk.bf16.mxu0 (!%p248_p3), %vm1688_vm0, %v1687_v1  ;;  %v1610_v6 = vld [vmem:[%s1988_s3 + $0x10] sm:$0xff] (!%p248_p3)   ;;  %v1611_v7 = vld [vmem:[%s1988_s3 + $0x38] sm:$0xff] (!%p248_p3)   ;;  %v1616_v11 = vld [vmem:[%s1988_s3 + $0x60] sm:$0xff] (!%p248_p3)   ;;  %p315_p7 = scmp.lt.s32.totalorder (!%p248_p3), %s312_s6, 17  ;;  %vm378_vm2 = vsmask.f32 (!%p248_p3), 7424 }
   0xc   : > { %1464 = vmatpush3.bf16.msra.mxu1 (!%p248_p3), %v1606_v2  ;;  %1453 = vmatprep.subr.bf16.mxu0 (!%p248_p3), %v1687_v1  ;;  %v1612_v8 = vld [vmem:[%s1988_s3 + $0x18] sm:$0xff] (!%p248_p3)   ;;  %v1615_v17 = vld [vmem:[%s1988_s3 + $0x40] sm:$0xff] (!%p248_p3)   ;;  %v1618_v19 = vld [vmem:[%s1988_s3 + $0x68] sm:$0xff] (!%p248_p3)   ;;  %p326_p8 = scmp.lt.s32.totalorder (!%p248_p3), %s323_s17, 17  ;;  %vm536_vm3 = vcmask (!%p248_p3), 1046528   ;;  %p336_p9 = scmp.lt.s32.totalorder (!%p248_p3), %s1669_s18, 15 }
   0xd   : > { %1465 = vmatprep.subr.bf16.mxu1 (!%p248_p3), %v1687_v1  ;;  %1471 = vmatprep.mubr.msk.bf16.mxu1 (!%p248_p3), %vm1688_vm0, %v1687_v1  ;;  %v1617_v21 = vld [vmem:[%s1988_s3 + $0x48] sm:$0xff] (!%p248_p3)   ;;  %v1620_v22 = vld [vmem:[%s1988_s3 + $0x70] sm:$0xff] (!%p248_p3)   ;;  %v1622_v24 = vld [vmem:[%s1988_s3 + $0x78] sm:$0xff] (!%p248_p3)   ;;  %vm1137_vm4 = vcmask (!%p248_p3), 72704  }
   0xe   : > { %v1619_v23 = vld [vmem:[%s1988_s3 + $0x50] sm:$0xff] (!%p248_p3)   ;;  %v1621_v25 = vld [vmem:[%s1988_s3 + $0x58] sm:$0xff] (!%p248_p3)   ;;  %v1625_v29 = vld [vmem:[%s1988_s3 + $0xa0] sm:$0xff] (!%p248_p3)  }
   0xf   : > { %1454 = vmatpush3.bf16.msra.mxu0 (!%p248_p3), %v1607_v3  ;;  %v1623_v30 = vld [vmem:[%s1988_s3 + $0x80] sm:$0xff] (!%p248_p3)   ;;  %v1627_v32 = vld [vmem:[%s1988_s3 + $0xa8] sm:$0xff] (!%p248_p3)   ;;  %v1629_v34 = vld [vmem:[%s1988_s3 + $0xb0] sm:$0xff] (!%p248_p3)  }
  0x10   : > { %s2002_s19 = smov (!%p303_p5, %s1673_s19), 1  ;;  %1466 = vmatpush3.bf16.msra.mxu1 %v1608_v4  ;;  %1455 = vmatprep.subr.bf16.mxu0 %v1687_v1  ;;  %s2004_s6 = smov (!%p315_p7, %s312_s6), 17  ;;  %v1626_v33 = vld [vmem:[%s1988_s3 + $0x88] sm:$0xff]   ;;  %v1628_v38 = vld [vmem:[%s1988_s3 + $0x90] sm:$0xff]   ;;  %v1631_v39 = vld [vmem:[%s1988_s3 + $0xb8] sm:$0xff]  }
  0x11   : > { %s306_s8 = scalar_select %p305_p6, %s1669_s18, 17  ;;  %1467 = vmatprep.subr.bf16.mxu1 %v1687_v1  ;;  %v1630_v44 = vld [vmem:[%s1988_s3 + $0x98] sm:$0xff]   ;;  %v1634_v48 = vld [vmem:[%s1988_s3 + $0xe0] sm:$0xff]   ;;  %v1636_v52 = vld [vmem:[%s1988_s3 + $0xe8] sm:$0xff]  }
  0x12   : > { %s1783_s11 = smul.u32 54, %s2002_s19  ;;  %s2006_s17 = smov (!%p326_p8, %s323_s17), 17  ;;  %v1633_v51 = vld [vmem:[%s1988_s3 + $0xc0] sm:$0xff]   ;;  %v1635_v55 = vld [vmem:[%s1988_s3 + $0xc8] sm:$0xff]   ;;  %v1638_v56 = vld [vmem:[%s1988_s3 + $0xf0] sm:$0xff]  }
  0x13   : > { %s1559_s14 = smul.u32 3, %s306_s8  ;;  %1456 = vmatpush3.bf16.msra.mxu0 %v1609_v5  ;;  %v1637_v60 = vld [vmem:[%s1988_s3 + $0xd0] sm:$0xff]   ;;  %v1640_v61 = vld [vmem:[%s1988_s3 + $0xf8] sm:$0xff]   ;;  %v1642_v3 = vld [vmem:[%s1988_s3 + $0x100] sm:$0xff]   ;;  %s2008_s18 = smov (!%p336_p9, %s1669_s18), 15 }
  0x14   : > { %1468 = vmatpush3.bf16.msra.mxu1 %v1610_v6  ;;  %1457 = vmatprep.subr.bf16.mxu0 %v1687_v1  ;;  %s1562_s16 = smul.u32 3, %s2006_s17  ;;  %v1639_v0 = vld [vmem:[%s1988_s3 + $0xd8] sm:$0xff]   ;;  %v1644_v4 = vld [vmem:[%s1988_s3 + $0x108] sm:$0xff]   ;;  %v1645_v5 = vld [vmem:[%s1988_s3 + $0x110] sm:$0xff]   ;;  %s1285_s7 = sshll.u32 %s2008_s18, 1 }
  0x15   : > { %s309_s15 = sadd.s32 %s1783_s11, %s1559_s14  ;;  %1469 = vmatprep.subr.bf16.mxu1 %v1687_v1  ;;  %s1561_s14 = smul.u32 3, %s2004_s6  ;;  %v1646_v6 = vld [vmem:[%s1988_s3 + $0x118] sm:$0xff]  }
  0x16   : > { %s1282_s25 = sshll.u32 %s309_s15, 2  ;;  %s330_s29 = sadd.s32 %s1562_s16, %s1783_s11 }
  0x17   : > { %s311_s30 = scalar_lea.vmem %s1985_s0, %s1282_s25  ;;  %1458 = vmatpush3.bf16.msra.mxu0 %v1611_v7  ;;  %s319_s27 = sadd.s32 %s1561_s14, %s1783_s11 }
  0x18   : > { %v1613_v9 = vld [vmem:[%s311_s30] sm:$0xff]   ;;  %v1614_v10 = vld [vmem:[%s311_s30 + $0x8] ss:$0 sps:$4 sm:$0x11]   ;;  %1470 = vmatpush3.bf16.msra.mxu1 %v1612_v8  ;;  %1475 = vmatprep.subr.bf16.mxu0 %v1687_v1  ;;  %s1283_s28 = sshll.u32 %s319_s27, 2  ;;  %s1284_s17 = sshll.u32 %s330_s29, 2 }
  0x19   : > { %v380_v12 = vshrl.u32 %v1613_v9, 16  ;;  %v382_v13 = vshll.u32 %v1613_v9, 16  ;;  %v387_v14 = vshll.u32 %v1614_v10, 16  ;;  %1487 = vmatprep.subr.bf16.mxu1 %v1687_v1  ;;  %s1835_s6 = scalar_lea.vmem %s1986_s1, %s1283_s28  ;;  %v537_v26 = vrot.slane %v1613_v9, 1  ;;  %s1873_s10 = scalar_lea.vmem %s1987_s2, %s1284_s17 }
  0x1a   : > { %v538_v27 = vrot.slane %v1614_v10, 1  ;;  %v1624_v28 = vld [vmem:[%s1835_s6] sm:$0xff]   ;;  %v1632_v35 = vld [vmem:[%s1835_s6 + $0x8] ss:$0 sps:$4 sm:$0x11]   ;;  %s1286_s8 = sshll.u32 %s2002_s19, 5 }
  0x1b   : > { %v384_v15 = vrot.slane %v382_v13, 1  ;;  %v389_v16 = vrot.slane %v387_v14, 1  ;;  %1472 = vmatmul.mubr.msk.bf16.vlgmr.msra.gmra.mrb[0].mxu1 %vm415_vm1, %v1613_v9  ;;  %v708_v36 = vshll.u32 %v1624_v28, 16  ;;  %v706_v37 = vshrl.u32 %v1624_v28, 16  ;;  %v1641_v49 = vld [vmem:[%s1873_s10] sm:$0xff]   ;;  %s340_s9 = sadd.s32 %s1286_s8, %s1285_s7 }
  0x1c   : > { %1488 = vmatpush3.bf16.msra.mxu1 %v1616_v11  ;;  %1495 = vmatprep.mubr.msk.bf16.mxu1 %vm1688_vm0, %v1687_v1  ;;  %v539_v31 = vsel %vm536_vm3, %v537_v26, %v538_v27  ;;  %v713_v41 = vshll.u32 %v1632_v35, 16  ;;  %v796_v42 = vrot.slane %v1624_v28, 1  ;;  %v797_v43 = vrot.slane %v1632_v35, 1  ;;  %v1643_v53 = vld [vmem:[%s1873_s10 + $0x8] ss:$0 sps:$4 sm:$0x11]  }
  0x1d   : > { %v385_v18 = vor.u32 %v384_v15, %v380_v12  ;;  %1489 = vmatprep.subr.bf16.mxu1 %v1687_v1  ;;  %v710_v40 = vrot.slane %v708_v36, 1  ;;  %v967_v54 = vshll.u32 %v1641_v49, 16  ;;  %v965_v57 = vshrl.u32 %v1641_v49, 16  ;;  %s1287_s11 = sshll.u32 %s340_s9, 3 }
  0x1e   : > { %v715_v46 = vrot.slane %v713_v41, 1  ;;  %v798_v47 = vsel %vm536_vm3, %v796_v42, %v797_v43  ;;  %v972_v59 = vshll.u32 %v1643_v53, 16  ;;  %v1055_v7 = vrot.slane %v1641_v49, 1  ;;  %s342_s15 = scalar_lea.vmem %s1990_s5, %s1287_s11 }
  0x1f   : > { %v390_v20 = vsel %vm378_vm2, %v385_v18, %v389_v16  ;;  %v711_v45 = vor.u32 %v710_v40, %v706_v37  ;;  %v969_v58 = vrot.slane %v967_v54, 1  ;;  %v1056_v8 = vrot.slane %v1643_v53, 1 }
  0x20   : > { %1460 = vmatmul.mubr.msk.bf16.vlgmr.msra.gmra.mrb[0].mxu0 %vm415_vm1, %v390_v20  ;;  %1490 = vmatpush3.bf16.msra.mxu1 %v1618_v19  ;;  %v974_v63 = vrot.slane %v972_v59, 1 }
  0x21   : > { %1476 = vmatpush3.bf16.msra.mxu0 %v1615_v17  ;;  %1491 = vmatprep.subr.bf16.mxu1 %v1687_v1  ;;  %v716_v50 = vsel %vm378_vm2, %v711_v45, %v715_v46  ;;  %v970_v62 = vor.u32 %v969_v58, %v965_v57  ;;  %v1057_v9 = vsel %vm536_vm3, %v1055_v7, %v1056_v8 }
  0x22   : > { %1477 = vmatprep.subr.bf16.mxu0 %v1687_v1  ;;  %1483 = vmatprep.mubr.msk.bf16.mxu0 %vm1688_vm0, %v1687_v1 }
  0x23   : > { %v975_v2 = vsel %vm378_vm2, %v970_v62, %v974_v63 }
  0x24   : > { %1492 = vmatpush3.bf16.msra.mxu1 %v1620_v22 }
  0x25   : > { %1478 = vmatpush3.bf16.msra.mxu0 %v1617_v21  ;;  %1493 = vmatprep.subr.bf16.mxu1 %v1687_v1 }
  0x26   : > { %1479 = vmatprep.subr.bf16.mxu0 %v1687_v1 }
  0x28   : > { %1494 = vmatpush3.bf16.msra.mxu1 %v1622_v24 }
  0x29   : > { %1480 = vmatpush3.bf16.msra.mxu0 %v1619_v23  ;;  %1511 = vmatprep.subr.bf16.mxu1 %v1687_v1 }
  0x2a   : > { %1481 = vmatprep.subr.bf16.mxu0 %v1687_v1 }
  0x2b   : > { %1496 = vmatmul.mubr.msk.bf16.vlgmr.msra.gmra.mrb[4].mxu1 %vm415_vm1, %v1624_v28 }
  0x2c   : > { %1512 = vmatpush3.bf16.msra.mxu1 %v1625_v29  ;;  %1519 = vmatprep.mubr.msk.bf16.mxu1 %vm1688_vm0, %v1687_v1 }
  0x2d   : > { %1482 = vmatpush3.bf16.msra.mxu0 %v1621_v25  ;;  %1513 = vmatprep.subr.bf16.mxu1 %v1687_v1 }
  0x2e   : > { %1499 = vmatprep.subr.bf16.mxu0 %v1687_v1 }
  0x30   : > { %1484 = vmatmul.mubr.msk.bf16.vlgmr.msra.gmra.mrb[4].mxu0 %vm415_vm1, %v539_v31  ;;  %1514 = vmatpush3.bf16.msra.mxu1 %v1627_v32 }
  0x31   : > { %1500 = vmatpush3.bf16.msra.mxu0 %v1623_v30  ;;  %1515 = vmatprep.subr.bf16.mxu1 %v1687_v1 }
  0x32   : > { %1501 = vmatprep.subr.bf16.mxu0 %v1687_v1  ;;  %1507 = vmatprep.mubr.msk.bf16.mxu0 %vm1688_vm0, %v1687_v1 }
  0x34   : > { %1516 = vmatpush3.bf16.msra.mxu1 %v1629_v34 }
  0x35   : > { %1502 = vmatpush3.bf16.msra.mxu0 %v1626_v33  ;;  %1517 = vmatprep.subr.bf16.mxu1 %v1687_v1 }
  0x36   : > { %1503 = vmatprep.subr.bf16.mxu0 %v1687_v1 }
  0x38   : > { %1518 = vmatpush3.bf16.msra.mxu1 %v1631_v39 }
  0x39   : > { %1504 = vmatpush3.bf16.msra.mxu0 %v1628_v38  ;;  %1535 = vmatprep.subr.bf16.mxu1 %v1687_v1 }
  0x3a   : > { %1505 = vmatprep.subr.bf16.mxu0 %v1687_v1 }
  0x3b   : > { %1520 = vmatmul.mubr.msk.bf16.vlgmr.msra.gmra.mrb[8].mxu1 %vm415_vm1, %v798_v47 }
  0x3c   : > { %1536 = vmatpush3.bf16.msra.mxu1 %v1634_v48  ;;  %1543 = vmatprep.mubr.msk.bf16.mxu1 %vm1688_vm0, %v1687_v1 }
  0x3d   : > { %1506 = vmatpush3.bf16.msra.mxu0 %v1630_v44  ;;  %1537 = vmatprep.subr.bf16.mxu1 %v1687_v1 }
  0x3e   : > { %1523 = vmatprep.subr.bf16.mxu0 %v1687_v1 }
  0x40   : > { %1508 = vmatmul.mubr.msk.bf16.vlgmr.msra.gmra.mrb[8].mxu0 %vm415_vm1, %v716_v50  ;;  %1538 = vmatpush3.bf16.msra.mxu1 %v1636_v52 }
  0x41   : > { %1524 = vmatpush3.bf16.msra.mxu0 %v1633_v51  ;;  %1539 = vmatprep.subr.bf16.mxu1 %v1687_v1 }
  0x42   : > { %1525 = vmatprep.subr.bf16.mxu0 %v1687_v1  ;;  %1531 = vmatprep.mubr.msk.bf16.mxu0 %vm1688_vm0, %v1687_v1 }
  0x44   : > { %1540 = vmatpush3.bf16.msra.mxu1 %v1638_v56  ;;  %v1403_v56 = vld [vmem:[%s1989_s4] ss:$0 sm:$0xff] }
  0x45   : > { %1526 = vmatpush3.bf16.msra.mxu0 %v1635_v55  ;;  %1541 = vmatprep.subr.bf16.mxu1 %v1687_v1 }
  0x46   : > { %1527 = vmatprep.subr.bf16.mxu0 %v1687_v1 }
  0x48   : > { %1542 = vmatpush3.bf16.msra.mxu1 %v1640_v61 }
  0x49   : > { %1528 = vmatpush3.bf16.msra.mxu0 %v1637_v60 }
  0x4a   : > { %1529 = vmatprep.subr.bf16.mxu0 %v1687_v1 }
  0x4b   : > { %1544 = vmatmul.mubr.msk.bf16.vlgmr.msra.gmra.mrb[12].mxu1 %vm415_vm1, %v975_v2 }
  0x4d   : > { %1530 = vmatpush3.bf16.msra.mxu0 %v1639_v0 }
  0x4e   : > { %1547 = vmatprep.subr.bf16.mxu0 %v1687_v1 }
  0x50   : > { %1532 = vmatmul.mubr.msk.bf16.vlgmr.msra.gmra.mrb[12].mxu0 %vm415_vm1, %v1641_v49 }
  0x51   : > { %1548 = vmatpush3.bf16.msra.mxu0 %v1642_v3  ;;  %1555 = vmatprep.mubr.msk.bf16.mxu0 %vm1688_vm0, %v1687_v1 }
  0x52   : > { %1549 = vmatprep.subr.bf16.mxu0 %v1687_v1 }
  0x55   : > { %1550 = vmatpush3.bf16.msra.mxu0 %v1644_v4 }
  0x56   : > { %1551 = vmatprep.subr.bf16.mxu0 %v1687_v1 }
  0x59   : > { %1552 = vmatpush3.bf16.msra.mxu0 %v1645_v5 }
  0x5a   : > { %1553 = vmatprep.subr.bf16.mxu0 %v1687_v1 }
  0x5d   : > { %1554 = vmatpush3.bf16.msra.mxu0 %v1646_v6 }
  0x60   : > { %1556 = vmatmul.mubr.msk.bf16.vlgmr.msra.gmra.mrb[16].mxu0 %vm415_vm1, %v1057_v9 }
  0xee   : > { %v520_v10 = vpop.f32.mrb[0].mxu1 }
  0xef   : > { %v1473_v11 = vpop.f32.mrb[1].mxu1 }
  0xf0   : > { %v523_v12 = vpop.f32.mrb[2].mxu1 }
  0xf1   : > { %v1474_v13 = vpop.f32.mrb[3].mxu1 }
  0xf3   : > { %v453_v14 = vpop.f32.mrb[0].mxu0 }
  0xf4   : > { %v521_v15 = vadd.f32 %v520_v10, %v453_v14  ;;  %v1461_v16 = vpop.f32.mrb[1].mxu0 }
  0xf5   : > { %v456_v17 = vpop.f32.mrb[2].mxu0 }
  0xf6   : > { %v524_v18 = vadd.f32 %v523_v12, %v456_v17  ;;  %v1462_v19 = vpop.f32.mrb[3].mxu0 }
  0xfe   : > { %v685_v20 = vpop.f32.mrb[4].mxu1 }
  0xff   : > { %v1497_v21 = vpop.f32.mrb[5].mxu1 }
 0x100   : > { %v688_v22 = vpop.f32.mrb[6].mxu1 }
 0x101   : > { %v1498_v23 = vpop.f32.mrb[7].mxu1 }
 0x103   : > { %v601_v1 = vpop.f32.mrb[4].mxu0 }
 0x104   : > { %v608_v24 = vadd.f32 %v601_v1, %v521_v15  ;;  %v1485_v25 = vpop.f32.mrb[5].mxu0 }
 0x105   : > { %v604_v26 = vpop.f32.mrb[6].mxu0 }
 0x106   : > { %v609_v27 = vadd.f32 %v604_v26, %v524_v18  ;;  %v692_v28 = vadd.f32 %v685_v20, %v608_v24  ;;  %v1486_v29 = vpop.f32.mrb[7].mxu0 }
 0x108   : > { %v693_v30 = vadd.f32 %v688_v22, %v609_v27 }
 0x10e   : > { %v860_v31 = vpop.f32.mrb[8].mxu1 }
 0x10f   : > { %v1521_v32 = vpop.f32.mrb[9].mxu1 }
 0x110   : > { %v863_v33 = vpop.f32.mrb[10].mxu1 }
 0x111   : > { %v1522_v34 = vpop.f32.mrb[11].mxu1 }
 0x113   : > { %v778_v35 = vpop.f32.mrb[8].mxu0 }
 0x114   : > { %v785_v36 = vadd.f32 %v778_v35, %v692_v28  ;;  %v1509_v37 = vpop.f32.mrb[9].mxu0 }
 0x115   : > { %v781_v38 = vpop.f32.mrb[10].mxu0 }
 0x116   : > { %v786_v39 = vadd.f32 %v781_v38, %v693_v30  ;;  %v867_v40 = vadd.f32 %v860_v31, %v785_v36  ;;  %v1510_v41 = vpop.f32.mrb[11].mxu0 }
 0x118   : > { %v868_v42 = vadd.f32 %v863_v33, %v786_v39 }
 0x11e   : > { %v1037_v43 = vpop.f32.mrb[12].mxu1 }
 0x11f   : > { %v1545_v44 = vpop.f32.mrb[13].mxu1 }
 0x120   : > { %v1040_v45 = vpop.f32.mrb[14].mxu1 }
 0x121   : > { %v1546_v46 = vpop.f32.mrb[15].mxu1 }
 0x123   : > { %v944_v47 = vpop.f32.mrb[12].mxu0 }
 0x124   : > { %v951_v48 = vadd.f32 %v944_v47, %v867_v40  ;;  %v1533_v49 = vpop.f32.mrb[13].mxu0 }
 0x125   : > { %v947_v50 = vpop.f32.mrb[14].mxu0 }
 0x126   : > { %v952_v51 = vadd.f32 %v947_v50, %v868_v42  ;;  %v1044_v52 = vadd.f32 %v1037_v43, %v951_v48  ;;  %v1534_v53 = vpop.f32.mrb[15].mxu0 }
 0x128   : > { %v1045_v54 = vadd.f32 %v1040_v45, %v952_v51 }
 0x133   : > { %v1119_v55 = vpop.f32.mrb[16].mxu0 }
 0x134   : > { %v1126_v57 = vadd.f32 %v1119_v55, %v1044_v52  ;;  %v1557_v58 = vpop.f32.mrb[17].mxu0 }
 0x135   : > { %v1122_v59 = vpop.f32.mrb[18].mxu0 }
 0x136   : > { %v1135_v60 = vadd.f32 %v1403_v56, %v1126_v57  ;;  %v1127_v61 = vadd.f32 %v1122_v59, %v1045_v54  ;;  %v1558_v62 = vpop.f32.mrb[19].mxu0 }
 0x138   : > { %1138 = vst.msk [vmem:[%s342_s15] sm:$0xff] %vm1137_vm4, %v1135_v60  ;;  %v1136_v63 = vadd.f32 %v1403_v56, %v1127_v61 }
 0x13a   : > { %1139 = vst.msk [vmem:[%s342_s15 + $0x8] sm:$0xff] %vm1137_vm4, %v1136_v63 }
 0x13b PF: > { %s15_s22 = sadd.s32 1, %s1685_s22   ;;  %s1991_s18 = smov %s1677_s20 }
 0x13c   : > { %p12_p10 = scmp.ge.s32.totalorder %s15_s22, 34   ;;  %s1992_s19 = smov %s1681_s21 }
 0x13d   : > { %s1993_s20 = smov %s1996_s23  ;;  %s1994_s21 = smov %s2000_s24 }
 0x13e   :  { %14 = sbr.rel (!%p12_p10) target bundleno = 3 (0x3), region = 84 }

</bundles_post_ra>
